<compile_context>
chip_gen: v7x
topology: tpu7x:2x2x1
jax: 0.10.0
libtpu: 0.0.40
codegen_flags: <defaults>
</compile_context>

<pallas_src>
import functools

import jax
import jax.numpy as jnp
from jax.experimental import pallas as pl
from jax.experimental.pallas import tpu as pltpu


# ---------------------------------------------------------------------------
# Fused kernel: grid = (batch_tiles, num_layers); one layer per grid step.
# ---------------------------------------------------------------------------
def _encoder_stack_kernel(
    x_ref, pos_ref,
    wq_ref, wk_ref, wv_ref, bq_ref, bk_ref, bv_ref,
    woh_ref, bo_ref, ln1w_ref, ln1b_ref,
    w1_ref, b1_ref, w2_ref, b2_ref, ln2w_ref, ln2b_ref,
    out_ref,
    act_ref,                      # VMEM scratch (Bt*S, D): layer-resident activation
    *, nhead: int, head_dim: int, eps: float = 1e-5,
):
    Bt, S, D = out_ref.shape
    R = Bt * S
    layer = pl.program_id(1)

    # Load the input activation once per batch tile (layer 0).
    @pl.when(layer == 0)
    def _():
        act_ref[...] = x_ref[...].reshape(R, D).astype(jnp.float32)

    x = act_ref[...]                                       # (R, D) f32
    pos = pos_ref[...].reshape(R, D).astype(jnp.float32)
    qk_in = x + pos

    # ---- in-projection (weights already (d_in, d_out); rows = Bt*S) -------
    q = jnp.dot(qk_in, wq_ref[0], preferred_element_type=jnp.float32) + bq_ref[0]
    k = jnp.dot(qk_in, wk_ref[0], preferred_element_type=jnp.float32) + bk_ref[0]
    v = jnp.dot(x,     wv_ref[0], preferred_element_type=jnp.float32) + bv_ref[0]

    q3 = q.reshape(Bt, S, D)
    k3 = k.reshape(Bt, S, D)
    v3 = v.reshape(Bt, S, D)

    scale = 1.0 / jnp.sqrt(jnp.float32(head_dim))
    woh = woh_ref[0]                                       # (H, head_dim, D)

    # ---- multi-head attention, batched over the batch tile ----------------
    attn = jnp.zeros((R, D), jnp.float32)
    for h in range(nhead):                                 # static unroll
        lo = h * head_dim
        hi = lo + head_dim
        qh = q3[:, :, lo:hi]                               # (Bt, S, hd)
        kh = k3[:, :, lo:hi]
        vh = v3[:, :, lo:hi]
        s = jnp.einsum("bqd,bkd->bqk", qh, kh,
                       preferred_element_type=jnp.float32) * scale
        s = s - jnp.max(s, axis=-1, keepdims=True)
        p = jnp.exp(s)
        p = p * pl.reciprocal(jnp.sum(p, axis=-1, keepdims=True), approx=True)
        ah = jnp.einsum("bqk,bkd->bqd", p, vh,
                        preferred_element_type=jnp.float32)   # (Bt, S, hd)
        # Per-head slice of the out-projection, accumulated directly
        # (sum_h ah @ Wo_h == concat_h(ah) @ Wo): no lane-dim concatenate.
        attn = attn + jnp.dot(ah.reshape(R, head_dim), woh[h],
                              preferred_element_type=jnp.float32)
    attn = attn + bo_ref[0]

    # ---- residual + LayerNorm1 ---------------------------------------------
    src = x + attn
    mu = jnp.mean(src, axis=-1, keepdims=True)
    var = jnp.mean((src - mu) ** 2, axis=-1, keepdims=True)
    src = (src - mu) * jax.lax.rsqrt(var + eps) * ln1w_ref[0] + ln1b_ref[0]

    # ---- feed-forward + residual + LayerNorm2 ------------------------------
    h1 = jnp.dot(src, w1_ref[0], preferred_element_type=jnp.float32) + b1_ref[0]
    h1 = jnp.maximum(h1, 0.0)                              # ReLU
    ff = jnp.dot(h1, w2_ref[0], preferred_element_type=jnp.float32) + b2_ref[0]
    src2 = src + ff
    mu = jnp.mean(src2, axis=-1, keepdims=True)
    var = jnp.mean((src2 - mu) ** 2, axis=-1, keepdims=True)
    y = (src2 - mu) * jax.lax.rsqrt(var + eps) * ln2w_ref[0] + ln2b_ref[0]

    act_ref[...] = y                                       # carry to next layer

    # Write HBM output only after the last layer for this batch tile.
    @pl.when(layer == pl.num_programs(1) - 1)
    def _():
        out_ref[...] = y.reshape(Bt, S, D).astype(out_ref.dtype)


def _layer_spec(shape):
    """BlockSpec selecting layer `l` of a layer-stacked parameter."""
    nd = len(shape)
    return pl.BlockSpec(
        (1,) + tuple(shape[1:]),
        lambda bt, l, _nd=nd: (l,) + (0,) * (_nd - 1),
    )


def encoder_stack_pallas(x_bsd, pos_bsd, layer_params_list, *, nhead, batch_tile=None):
    """Runs the whole encoder stack in one pallas_call. x_bsd, pos_bsd: (B, S, D)."""
    B, S, D = x_bsd.shape
    L = len(layer_params_list)
    head_dim = D // nhead

    Bt = B if batch_tile is None else batch_tile
    assert B % Bt == 0, (B, Bt)

    def st(name):
        return jnp.stack([p[name] for p in layer_params_list], axis=0)

    # Pre-transpose PyTorch (out, in) weights to (in, out) on the host; split
    # the out-projection per head: (L, H, head_dim, D).
    wq_t = jnp.transpose(st("wq"), (0, 2, 1))
    wk_t = jnp.transpose(st("wk"), (0, 2, 1))
    wv_t = jnp.transpose(st("wv"), (0, 2, 1))
    wo_h = jnp.transpose(st("wo"), (0, 2, 1)).reshape(L, nhead, head_dim, D)
    w1_t = jnp.transpose(st("w1"), (0, 2, 1))              # (L, D, FF)
    w2_t = jnp.transpose(st("w2"), (0, 2, 1))              # (L, FF, D)

    weights = [
        wq_t, wk_t, wv_t,
        st("bq"), st("bk"), st("bv"),
        wo_h, st("bo"),
        st("ln1w"), st("ln1b"),
        w1_t, st("b1"), w2_t, st("b2"),
        st("ln2w"), st("ln2b"),
    ]

    kernel = functools.partial(_encoder_stack_kernel, nhead=nhead, head_dim=head_dim)

    act_spec = pl.BlockSpec((Bt, S, D), lambda bt, l: (bt, 0, 0))
    in_specs = [act_spec, act_spec] + [_layer_spec(w.shape) for w in weights]
    out_spec = pl.BlockSpec((Bt, S, D), lambda bt, l: (bt, 0, 0))

    return pl.pallas_call(
        kernel,
        out_shape=jax.ShapeDtypeStruct((B, S, D), x_bsd.dtype),
        grid_spec=pltpu.PrefetchScalarGridSpec(
            num_scalar_prefetch=0,
            grid=(B // Bt, L),                   # layer (reduction-like) axis last
            in_specs=in_specs,
            out_specs=out_spec,
            scratch_shapes=[pltpu.VMEM((Bt * S, D), jnp.float32)],
        ),
        compiler_params=pltpu.CompilerParams(
            dimension_semantics=("parallel", "arbitrary"),
        ),
    )(x_bsd, pos_bsd, *weights)


# ---------------------------------------------------------------------------
# TransformerEncoder wrapper.
# ---------------------------------------------------------------------------
def transformer_encoder(src_sbd, pos_sbd, layer_params_list, *, nhead, batch_tile=None):
    """src_sbd, pos_sbd: (S, B, D) as in PyTorch. Returns (S, B, D)."""
    x = jnp.transpose(src_sbd, (1, 0, 2))       # (B, S, D)
    pos = jnp.transpose(pos_sbd, (1, 0, 2))
    out = encoder_stack_pallas(x, pos, layer_params_list, nhead=nhead,
                               batch_tile=batch_tile)
    # TODO(synk): final `norm` is None in this configuration (DETR default); skip.
    return jnp.transpose(out, (1, 0, 2))        # back to (S, B, D)


def init_layer_params(key, d_model, dim_ff):
    ks = jax.random.split(key, 8)
    s = 0.05
    return {
        "wq": s * jax.random.normal(ks[0], (d_model, d_model), jnp.float32),
        "wk": s * jax.random.normal(ks[1], (d_model, d_model), jnp.float32),
        "wv": s * jax.random.normal(ks[2], (d_model, d_model), jnp.float32),
        "bq": jnp.zeros((1, d_model), jnp.float32),
        "bk": jnp.zeros((1, d_model), jnp.float32),
        "bv": jnp.zeros((1, d_model), jnp.float32),
        "wo": s * jax.random.normal(ks[3], (d_model, d_model), jnp.float32),
        "bo": 0.01 * jnp.ones((1, d_model), jnp.float32),
        "ln1w": jnp.ones((1, d_model), jnp.float32),
        "ln1b": jnp.zeros((1, d_model), jnp.float32),
        "w1": s * jax.random.normal(ks[4], (dim_ff, d_model), jnp.float32),
        "b1": 0.01 * jnp.ones((1, dim_ff), jnp.float32),
        "w2": s * jax.random.normal(ks[5], (d_model, dim_ff), jnp.float32),
        "b2": 0.01 * jnp.ones((1, d_model), jnp.float32),
        "ln2w": jnp.ones((1, d_model), jnp.float32),
        "ln2b": jnp.zeros((1, d_model), jnp.float32),
    }


if __name__ == "__main__":
    # Small shapes: seq=16, batch=2, d_model=32, nhead=4, dim_ff=64, 2 layers.
    S, B, D = 16, 2, 32
    NHEAD, DIM_FF, NUM_LAYERS = 4, 64, 2

    root = jax.random.PRNGKey(0)
    k_src, k_pos, k_params = jax.random.split(root, 3)

    src = jax.random.normal(k_src, (S, B, D), jnp.float32)   # (seq, batch, d_model)
    pos = jax.random.normal(k_pos, (S, B, D), jnp.float32)

    layer_keys = jax.random.split(k_params, NUM_LAYERS)
    layer_params = [init_layer_params(k, D, DIM_FF) for k in layer_keys]

    out = transformer_encoder(src, pos, layer_params, nhead=NHEAD)
    out = jax.block_until_ready(out)

    assert out.shape == (S, B, D), out.shape
    assert bool(jnp.all(jnp.isfinite(out)))
    print("KERNEL_OK")
</pallas_src>

<mosaic_0001>
module attributes {stable_mosaic.version = 11 : i64} {
  func.func @_encoder_stack_kernel(%arg0: i32, %arg1: i32, %arg2: memref<2x16x32xf32, #tpu.memory_space<vmem>>, %arg3: memref<2x16x32xf32, #tpu.memory_space<vmem>>, %arg4: memref<1x32x32xf32, #tpu.memory_space<vmem>>, %arg5: memref<1x32x32xf32, #tpu.memory_space<vmem>>, %arg6: memref<1x32x32xf32, #tpu.memory_space<vmem>>, %arg7: memref<1x1x32xf32, #tpu.memory_space<vmem>>, %arg8: memref<1x1x32xf32, #tpu.memory_space<vmem>>, %arg9: memref<1x1x32xf32, #tpu.memory_space<vmem>>, %arg10: memref<1x4x8x32xf32, #tpu.memory_space<vmem>>, %arg11: memref<1x1x32xf32, #tpu.memory_space<vmem>>, %arg12: memref<1x1x32xf32, #tpu.memory_space<vmem>>, %arg13: memref<1x1x32xf32, #tpu.memory_space<vmem>>, %arg14: memref<1x32x64xf32, #tpu.memory_space<vmem>>, %arg15: memref<1x1x64xf32, #tpu.memory_space<vmem>>, %arg16: memref<1x64x32xf32, #tpu.memory_space<vmem>>, %arg17: memref<1x1x32xf32, #tpu.memory_space<vmem>>, %arg18: memref<1x1x32xf32, #tpu.memory_space<vmem>>, %arg19: memref<1x1x32xf32, #tpu.memory_space<vmem>>, %arg20: memref<2x16x32xf32, #tpu.memory_space<vmem>>, %arg21: memref<32x32xf32, #tpu.memory_space<vmem>>) attributes {dimension_semantics = [#tpu.dimension_semantics<parallel>, #tpu.dimension_semantics<arbitrary>], iteration_bounds = array<i64: 1, 2>, scalar_prefetch = 0 : i64, scratch_operands = 1 : i64, tpu.core_type = #tpu.core_type<tc>, window_params = [{transform_indices = @transform_0, window_bounds = array<i64: 2, 16, 32>}, {transform_indices = @transform_1, window_bounds = array<i64: 2, 16, 32>}, {transform_indices = @transform_2, window_bounds = array<i64: 1, 32, 32>}, {transform_indices = @transform_3, window_bounds = array<i64: 1, 32, 32>}, {transform_indices = @transform_4, window_bounds = array<i64: 1, 32, 32>}, {transform_indices = @transform_5, window_bounds = array<i64: 1, 1, 32>}, {transform_indices = @transform_6, window_bounds = array<i64: 1, 1, 32>}, {transform_indices = @transform_7, window_bounds = array<i64: 1, 1, 32>}, {transform_indices = @transform_8, window_bounds = array<i64: 1, 4, 8, 32>}, {transform_indices = @transform_9, window_bounds = array<i64: 1, 1, 32>}, {transform_indices = @transform_10, window_bounds = array<i64: 1, 1, 32>}, {transform_indices = @transform_11, window_bounds = array<i64: 1, 1, 32>}, {transform_indices = @transform_12, window_bounds = array<i64: 1, 32, 64>}, {transform_indices = @transform_13, window_bounds = array<i64: 1, 1, 64>}, {transform_indices = @transform_14, window_bounds = array<i64: 1, 64, 32>}, {transform_indices = @transform_15, window_bounds = array<i64: 1, 1, 32>}, {transform_indices = @transform_16, window_bounds = array<i64: 1, 1, 32>}, {transform_indices = @transform_17, window_bounds = array<i64: 1, 1, 32>}, {transform_indices = @transform_18, window_bounds = array<i64: 2, 16, 32>}]} {
    %c0_i32 = arith.constant 0 : i32
    %0 = arith.cmpi eq, %arg1, %c0_i32 : i32
    %1 = arith.extui %0 : i1 to i32
    %c0_i32_0 = arith.constant 0 : i32
    %2 = arith.cmpi ne, %1, %c0_i32_0 : i32
    scf.if %2 {
      %c0_95 = arith.constant 0 : index
      %c0_96 = arith.constant 0 : index
      %c0_97 = arith.constant 0 : index
      %202 = vector.load %arg2[%c0_95, %c0_96, %c0_97] : memref<2x16x32xf32, #tpu.memory_space<vmem>>, vector<2x16x32xf32>
      %203 = vector.shape_cast %202 : vector<2x16x32xf32> to vector<32x32xf32>
      %c0_98 = arith.constant 0 : index
      %c0_99 = arith.constant 0 : index
      %204 = vector.load %arg21[%c0_98, %c0_99] : memref<32x32xf32, #tpu.memory_space<vmem>>, vector<32x32xf32>
      tpu.vector_store %arg21[%c0_98, %c0_99], %203 {strides = array<i32>} : memref<32x32xf32, #tpu.memory_space<vmem>>, vector<32x32xf32>,
    } else {
    }
    %c0 = arith.constant 0 : index
    %c0_1 = arith.constant 0 : index
    %3 = vector.load %arg21[%c0, %c0_1] : memref<32x32xf32, #tpu.memory_space<vmem>>, vector<32x32xf32>
    %c0_2 = arith.constant 0 : index
    %c0_3 = arith.constant 0 : index
    %c0_4 = arith.constant 0 : index
    %4 = vector.load %arg3[%c0_2, %c0_3, %c0_4] : memref<2x16x32xf32, #tpu.memory_space<vmem>>, vector<2x16x32xf32>
    %5 = vector.shape_cast %4 : vector<2x16x32xf32> to vector<32x32xf32>
    %6 = arith.addf %3, %5 : vector<32x32xf32>
    %c0_5 = arith.constant 0 : index
    %c0_6 = arith.constant 0 : index
    %c0_7 = arith.constant 0 : index
    %7 = vector.load %arg4[%c0_5, %c0_6, %c0_7] : memref<1x32x32xf32, #tpu.memory_space<vmem>>, vector<1x32x32xf32>
    %8 = vector.shape_cast %7 : vector<1x32x32xf32> to vector<32x32xf32>
    %cst = arith.constant dense<0.000000e+00> : vector<32x32xf32>
    %9 = tpu.matmul %6, %8, %cst {dimension_numbers = #tpu.dot_dimension_numbers<[1], [0], [0], [1], [0, 0, 1, 1], [], []>} : vector<32x32xf32>, vector<32x32xf32>, vector<32x32xf32> -> vector<32x32xf32>
    %c0_8 = arith.constant 0 : index
    %c0_9 = arith.constant 0 : index
    %c0_10 = arith.constant 0 : index
    %10 = vector.load %arg7[%c0_8, %c0_9, %c0_10] : memref<1x1x32xf32, #tpu.memory_space<vmem>>, vector<1x1x32xf32>
    %11 = vector.shape_cast %10 : vector<1x1x32xf32> to vector<1x32xf32>
    %12 = vector.broadcast %11 : vector<1x32xf32> to vector<32x32xf32>
    %13 = arith.addf %9, %12 : vector<32x32xf32>
    %c0_11 = arith.constant 0 : index
    %c0_12 = arith.constant 0 : index
    %c0_13 = arith.constant 0 : index
    %14 = vector.load %arg5[%c0_11, %c0_12, %c0_13] : memref<1x32x32xf32, #tpu.memory_space<vmem>>, vector<1x32x32xf32>
    %15 = vector.shape_cast %14 : vector<1x32x32xf32> to vector<32x32xf32>
    %cst_14 = arith.constant dense<0.000000e+00> : vector<32x32xf32>
    %16 = tpu.matmul %6, %15, %cst_14 {dimension_numbers = #tpu.dot_dimension_numbers<[1], [0], [0], [1], [0, 0, 1, 1], [], []>} : vector<32x32xf32>, vector<32x32xf32>, vector<32x32xf32> -> vector<32x32xf32>
    %c0_15 = arith.constant 0 : index
    %c0_16 = arith.constant 0 : index
    %c0_17 = arith.constant 0 : index
    %17 = vector.load %arg8[%c0_15, %c0_16, %c0_17] : memref<1x1x32xf32, #tpu.memory_space<vmem>>, vector<1x1x32xf32>
    %18 = vector.shape_cast %17 : vector<1x1x32xf32> to vector<1x32xf32>
    %19 = vector.broadcast %18 : vector<1x32xf32> to vector<32x32xf32>
    %20 = arith.addf %16, %19 : vector<32x32xf32>
    %c0_18 = arith.constant 0 : index
    %c0_19 = arith.constant 0 : index
    %c0_20 = arith.constant 0 : index
    %21 = vector.load %arg6[%c0_18, %c0_19, %c0_20] : memref<1x32x32xf32, #tpu.memory_space<vmem>>, vector<1x32x32xf32>
    %22 = vector.shape_cast %21 : vector<1x32x32xf32> to vector<32x32xf32>
    %cst_21 = arith.constant dense<0.000000e+00> : vector<32x32xf32>
    %23 = tpu.matmul %3, %22, %cst_21 {dimension_numbers = #tpu.dot_dimension_numbers<[1], [0], [0], [1], [0, 0, 1, 1], [], []>} : vector<32x32xf32>, vector<32x32xf32>, vector<32x32xf32> -> vector<32x32xf32>
    %c0_22 = arith.constant 0 : index
    %c0_23 = arith.constant 0 : index
    %c0_24 = arith.constant 0 : index
    %24 = vector.load %arg9[%c0_22, %c0_23, %c0_24] : memref<1x1x32xf32, #tpu.memory_space<vmem>>, vector<1x1x32xf32>
    %25 = vector.shape_cast %24 : vector<1x1x32xf32> to vector<1x32xf32>
    %26 = vector.broadcast %25 : vector<1x32xf32> to vector<32x32xf32>
    %27 = arith.addf %23, %26 : vector<32x32xf32>
    %28 = vector.shape_cast %13 : vector<32x32xf32> to vector<2x16x32xf32>
    %29 = vector.shape_cast %20 : vector<32x32xf32> to vector<2x16x32xf32>
    %30 = vector.shape_cast %27 : vector<32x32xf32> to vector<2x16x32xf32>
    %cst_25 = arith.constant 8.000000e+00 : f32
    %31 = math.sqrt %cst_25 : f32
    %cst_26 = arith.constant 1.000000e+00 : f32
    %32 = arith.divf %cst_26, %31 : f32
    %c0_27 = arith.constant 0 : index
    %c0_28 = arith.constant 0 : index
    %c0_29 = arith.constant 0 : index
    %c0_30 = arith.constant 0 : index
    %33 = vector.load %arg10[%c0_27, %c0_28, %c0_29, %c0_30] : memref<1x4x8x32xf32, #tpu.memory_space<vmem>>, vector<1x4x8x32xf32>
    %34 = vector.shape_cast %33 : vector<1x4x8x32xf32> to vector<4x8x32xf32>
    %cst_31 = arith.constant 0.000000e+00 : f32
    %35 = vector.broadcast %cst_31 : f32 to vector<32x32xf32>
    %36 = vector.extract_strided_slice %28 {offsets = [0, 0, 0], sizes = [2, 16, 8], strides = [1, 1, 1]} : vector<2x16x32xf32> to vector<2x16x8xf32>
    %37 = vector.extract_strided_slice %29 {offsets = [0, 0, 0], sizes = [2, 16, 8], strides = [1, 1, 1]} : vector<2x16x32xf32> to vector<2x16x8xf32>
    %38 = vector.extract_strided_slice %30 {offsets = [0, 0, 0], sizes = [2, 16, 8], strides = [1, 1, 1]} : vector<2x16x32xf32> to vector<2x16x8xf32>
    "tpu.trace_start"() <{level = 10 : i32, message = "bqd,bkd->bqk"}> : () -> ()
    %cst_32 = arith.constant dense<0.000000e+00> : vector<2x16x16xf32>
    %39 = tpu.matmul %36, %37, %cst_32 {dimension_numbers = #tpu.dot_dimension_numbers<[2], [2], [1], [1], [0, 0, 0, 1, 1, 1], [0], [0]>} : vector<2x16x8xf32>, vector<2x16x8xf32>, vector<2x16x16xf32> -> vector<2x16x16xf32>
    "tpu.trace_stop"() : () -> ()
    %40 = vector.broadcast %32 : f32 to vector<2x16x16xf32>
    %41 = arith.mulf %39, %40 : vector<2x16x16xf32>
    %cst_33 = arith.constant dense<0xFF800000> : vector<2x16xf32>
    %42 = vector.multi_reduction <maximumf>, %41, %cst_33 [2] : vector<2x16x16xf32> to vector<2x16xf32>
    %43 = vector.shape_cast %42 : vector<2x16xf32> to vector<2x16x1xf32>
    %44 = vector.broadcast %43 : vector<2x16x1xf32> to vector<2x16x16xf32>
    %45 = arith.subf %41, %44 : vector<2x16x16xf32>
    %46 = math.exp %45 : vector<2x16x16xf32>
    %cst_34 = arith.constant dense<0.000000e+00> : vector<2x16xf32>
    %47 = vector.multi_reduction <add>, %46, %cst_34 [2] : vector<2x16x16xf32> to vector<2x16xf32>
    %48 = vector.shape_cast %47 : vector<2x16xf32> to vector<2x16x1xf32>
    %49 = tpu.reciprocal %48 {approx = true} : vector<2x16x1xf32> -> vector<2x16x1xf32>
    %50 = vector.broadcast %49 : vector<2x16x1xf32> to vector<2x16x16xf32>
    %51 = arith.mulf %46, %50 : vector<2x16x16xf32>
    "tpu.trace_start"() <{level = 10 : i32, message = "bqk,bkd->bqd"}> : () -> ()
    %cst_35 = arith.constant dense<0.000000e+00> : vector<2x16x8xf32>
    %52 = tpu.matmul %51, %38, %cst_35 {dimension_numbers = #tpu.dot_dimension_numbers<[2], [1], [1], [2], [0, 0, 0, 1, 1, 2], [0], [0]>} : vector<2x16x16xf32>, vector<2x16x8xf32>, vector<2x16x8xf32> -> vector<2x16x8xf32>
    "tpu.trace_stop"() : () -> ()
    %53 = vector.shape_cast %52 : vector<2x16x8xf32> to vector<32x8xf32>
    %54 = vector.extract_strided_slice %34 {offsets = [0, 0, 0], sizes = [1, 8, 32], strides = [1, 1, 1]} : vector<4x8x32xf32> to vector<1x8x32xf32>
    %55 = vector.shape_cast %54 : vector<1x8x32xf32> to vector<8x32xf32>
    %cst_36 = arith.constant dense<0.000000e+00> : vector<32x32xf32>
    %56 = tpu.matmul %53, %55, %cst_36 {dimension_numbers = #tpu.dot_dimension_numbers<[1], [0], [0], [1], [0, 0, 1, 1], [], []>} : vector<32x8xf32>, vector<8x32xf32>, vector<32x32xf32> -> vector<32x32xf32>
    %57 = arith.addf %35, %56 : vector<32x32xf32>
    %58 = vector.extract_strided_slice %28 {offsets = [0, 0, 8], sizes = [2, 16, 8], strides = [1, 1, 1]} : vector<2x16x32xf32> to vector<2x16x8xf32>
    %59 = vector.extract_strided_slice %29 {offsets = [0, 0, 8], sizes = [2, 16, 8], strides = [1, 1, 1]} : vector<2x16x32xf32> to vector<2x16x8xf32>
    %60 = vector.extract_strided_slice %30 {offsets = [0, 0, 8], sizes = [2, 16, 8], strides = [1, 1, 1]} : vector<2x16x32xf32> to vector<2x16x8xf32>
    "tpu.trace_start"() <{level = 10 : i32, message = "bqd,bkd->bqk"}> : () -> ()
    %cst_37 = arith.constant dense<0.000000e+00> : vector<2x16x16xf32>
    %61 = tpu.matmul %58, %59, %cst_37 {dimension_numbers = #tpu.dot_dimension_numbers<[2], [2], [1], [1], [0, 0, 0, 1, 1, 1], [0], [0]>} : vector<2x16x8xf32>, vector<2x16x8xf32>, vector<2x16x16xf32> -> vector<2x16x16xf32>
    "tpu.trace_stop"() : () -> ()
    %62 = vector.broadcast %32 : f32 to vector<2x16x16xf32>
    %63 = arith.mulf %61, %62 : vector<2x16x16xf32>
    %cst_38 = arith.constant dense<0xFF800000> : vector<2x16xf32>
    %64 = vector.multi_reduction <maximumf>, %63, %cst_38 [2] : vector<2x16x16xf32> to vector<2x16xf32>
    %65 = vector.shape_cast %64 : vector<2x16xf32> to vector<2x16x1xf32>
    %66 = vector.broadcast %65 : vector<2x16x1xf32> to vector<2x16x16xf32>
    %67 = arith.subf %63, %66 : vector<2x16x16xf32>
    %68 = math.exp %67 : vector<2x16x16xf32>
    %cst_39 = arith.constant dense<0.000000e+00> : vector<2x16xf32>
    %69 = vector.multi_reduction <add>, %68, %cst_39 [2] : vector<2x16x16xf32> to vector<2x16xf32>
    %70 = vector.shape_cast %69 : vector<2x16xf32> to vector<2x16x1xf32>
    %71 = tpu.reciprocal %70 {approx = true} : vector<2x16x1xf32> -> vector<2x16x1xf32>
    %72 = vector.broadcast %71 : vector<2x16x1xf32> to vector<2x16x16xf32>
    %73 = arith.mulf %68, %72 : vector<2x16x16xf32>
    "tpu.trace_start"() <{level = 10 : i32, message = "bqk,bkd->bqd"}> : () -> ()
    %cst_40 = arith.constant dense<0.000000e+00> : vector<2x16x8xf32>
    %74 = tpu.matmul %73, %60, %cst_40 {dimension_numbers = #tpu.dot_dimension_numbers<[2], [1], [1], [2], [0, 0, 0, 1, 1, 2], [0], [0]>} : vector<2x16x16xf32>, vector<2x16x8xf32>, vector<2x16x8xf32> -> vector<2x16x8xf32>
    "tpu.trace_stop"() : () -> ()
    %75 = vector.shape_cast %74 : vector<2x16x8xf32> to vector<32x8xf32>
    %76 = vector.extract_strided_slice %34 {offsets = [1, 0, 0], sizes = [1, 8, 32], strides = [1, 1, 1]} : vector<4x8x32xf32> to vector<1x8x32xf32>
    %77 = vector.shape_cast %76 : vector<1x8x32xf32> to vector<8x32xf32>
    %cst_41 = arith.constant dense<0.000000e+00> : vector<32x32xf32>
    %78 = tpu.matmul %75, %77, %cst_41 {dimension_numbers = #tpu.dot_dimension_numbers<[1], [0], [0], [1], [0, 0, 1, 1], [], []>} : vector<32x8xf32>, vector<8x32xf32>, vector<32x32xf32> -> vector<32x32xf32>
    %79 = arith.addf %57, %78 : vector<32x32xf32>
    %80 = vector.extract_strided_slice %28 {offsets = [0, 0, 16], sizes = [2, 16, 8], strides = [1, 1, 1]} : vector<2x16x32xf32> to vector<2x16x8xf32>
    %81 = vector.extract_strided_slice %29 {offsets = [0, 0, 16], sizes = [2, 16, 8], strides = [1, 1, 1]} : vector<2x16x32xf32> to vector<2x16x8xf32>
    %82 = vector.extract_strided_slice %30 {offsets = [0, 0, 16], sizes = [2, 16, 8], strides = [1, 1, 1]} : vector<2x16x32xf32> to vector<2x16x8xf32>
    "tpu.trace_start"() <{level = 10 : i32, message = "bqd,bkd->bqk"}> : () -> ()
    %cst_42 = arith.constant dense<0.000000e+00> : vector<2x16x16xf32>
    %83 = tpu.matmul %80, %81, %cst_42 {dimension_numbers = #tpu.dot_dimension_numbers<[2], [2], [1], [1], [0, 0, 0, 1, 1, 1], [0], [0]>} : vector<2x16x8xf32>, vector<2x16x8xf32>, vector<2x16x16xf32> -> vector<2x16x16xf32>
    "tpu.trace_stop"() : () -> ()
    %84 = vector.broadcast %32 : f32 to vector<2x16x16xf32>
    %85 = arith.mulf %83, %84 : vector<2x16x16xf32>
    %cst_43 = arith.constant dense<0xFF800000> : vector<2x16xf32>
    %86 = vector.multi_reduction <maximumf>, %85, %cst_43 [2] : vector<2x16x16xf32> to vector<2x16xf32>
    %87 = vector.shape_cast %86 : vector<2x16xf32> to vector<2x16x1xf32>
    %88 = vector.broadcast %87 : vector<2x16x1xf32> to vector<2x16x16xf32>
    %89 = arith.subf %85, %88 : vector<2x16x16xf32>
    %90 = math.exp %89 : vector<2x16x16xf32>
    %cst_44 = arith.constant dense<0.000000e+00> : vector<2x16xf32>
    %91 = vector.multi_reduction <add>, %90, %cst_44 [2] : vector<2x16x16xf32> to vector<2x16xf32>
    %92 = vector.shape_cast %91 : vector<2x16xf32> to vector<2x16x1xf32>
    %93 = tpu.reciprocal %92 {approx = true} : vector<2x16x1xf32> -> vector<2x16x1xf32>
    %94 = vector.broadcast %93 : vector<2x16x1xf32> to vector<2x16x16xf32>
    %95 = arith.mulf %90, %94 : vector<2x16x16xf32>
    "tpu.trace_start"() <{level = 10 : i32, message = "bqk,bkd->bqd"}> : () -> ()
    %cst_45 = arith.constant dense<0.000000e+00> : vector<2x16x8xf32>
    %96 = tpu.matmul %95, %82, %cst_45 {dimension_numbers = #tpu.dot_dimension_numbers<[2], [1], [1], [2], [0, 0, 0, 1, 1, 2], [0], [0]>} : vector<2x16x16xf32>, vector<2x16x8xf32>, vector<2x16x8xf32> -> vector<2x16x8xf32>
    "tpu.trace_stop"() : () -> ()
    %97 = vector.shape_cast %96 : vector<2x16x8xf32> to vector<32x8xf32>
    %98 = vector.extract_strided_slice %34 {offsets = [2, 0, 0], sizes = [1, 8, 32], strides = [1, 1, 1]} : vector<4x8x32xf32> to vector<1x8x32xf32>
    %99 = vector.shape_cast %98 : vector<1x8x32xf32> to vector<8x32xf32>
    %cst_46 = arith.constant dense<0.000000e+00> : vector<32x32xf32>
    %100 = tpu.matmul %97, %99, %cst_46 {dimension_numbers = #tpu.dot_dimension_numbers<[1], [0], [0], [1], [0, 0, 1, 1], [], []>} : vector<32x8xf32>, vector<8x32xf32>, vector<32x32xf32> -> vector<32x32xf32>
    %101 = arith.addf %79, %100 : vector<32x32xf32>
    %102 = vector.extract_strided_slice %28 {offsets = [0, 0, 24], sizes = [2, 16, 8], strides = [1, 1, 1]} : vector<2x16x32xf32> to vector<2x16x8xf32>
    %103 = vector.extract_strided_slice %29 {offsets = [0, 0, 24], sizes = [2, 16, 8], strides = [1, 1, 1]} : vector<2x16x32xf32> to vector<2x16x8xf32>
    %104 = vector.extract_strided_slice %30 {offsets = [0, 0, 24], sizes = [2, 16, 8], strides = [1, 1, 1]} : vector<2x16x32xf32> to vector<2x16x8xf32>
    "tpu.trace_start"() <{level = 10 : i32, message = "bqd,bkd->bqk"}> : () -> ()
    %cst_47 = arith.constant dense<0.000000e+00> : vector<2x16x16xf32>
    %105 = tpu.matmul %102, %103, %cst_47 {dimension_numbers = #tpu.dot_dimension_numbers<[2], [2], [1], [1], [0, 0, 0, 1, 1, 1], [0], [0]>} : vector<2x16x8xf32>, vector<2x16x8xf32>, vector<2x16x16xf32> -> vector<2x16x16xf32>
    "tpu.trace_stop"() : () -> ()
    %106 = vector.broadcast %32 : f32 to vector<2x16x16xf32>
    %107 = arith.mulf %105, %106 : vector<2x16x16xf32>
    %cst_48 = arith.constant dense<0xFF800000> : vector<2x16xf32>
    %108 = vector.multi_reduction <maximumf>, %107, %cst_48 [2] : vector<2x16x16xf32> to vector<2x16xf32>
    %109 = vector.shape_cast %108 : vector<2x16xf32> to vector<2x16x1xf32>
    %110 = vector.broadcast %109 : vector<2x16x1xf32> to vector<2x16x16xf32>
    %111 = arith.subf %107, %110 : vector<2x16x16xf32>
    %112 = math.exp %111 : vector<2x16x16xf32>
    %cst_49 = arith.constant dense<0.000000e+00> : vector<2x16xf32>
    %113 = vector.multi_reduction <add>, %112, %cst_49 [2] : vector<2x16x16xf32> to vector<2x16xf32>
    %114 = vector.shape_cast %113 : vector<2x16xf32> to vector<2x16x1xf32>
    %115 = tpu.reciprocal %114 {approx = true} : vector<2x16x1xf32> -> vector<2x16x1xf32>
    %116 = vector.broadcast %115 : vector<2x16x1xf32> to vector<2x16x16xf32>
    %117 = arith.mulf %112, %116 : vector<2x16x16xf32>
    "tpu.trace_start"() <{level = 10 : i32, message = "bqk,bkd->bqd"}> : () -> ()
    %cst_50 = arith.constant dense<0.000000e+00> : vector<2x16x8xf32>
    %118 = tpu.matmul %117, %104, %cst_50 {dimension_numbers = #tpu.dot_dimension_numbers<[2], [1], [1], [2], [0, 0, 0, 1, 1, 2], [0], [0]>} : vector<2x16x16xf32>, vector<2x16x8xf32>, vector<2x16x8xf32> -> vector<2x16x8xf32>
    "tpu.trace_stop"() : () -> ()
    %119 = vector.shape_cast %118 : vector<2x16x8xf32> to vector<32x8xf32>
    %120 = vector.extract_strided_slice %34 {offsets = [3, 0, 0], sizes = [1, 8, 32], strides = [1, 1, 1]} : vector<4x8x32xf32> to vector<1x8x32xf32>
    %121 = vector.shape_cast %120 : vector<1x8x32xf32> to vector<8x32xf32>
    %cst_51 = arith.constant dense<0.000000e+00> : vector<32x32xf32>
    %122 = tpu.matmul %119, %121, %cst_51 {dimension_numbers = #tpu.dot_dimension_numbers<[1], [0], [0], [1], [0, 0, 1, 1], [], []>} : vector<32x8xf32>, vector<8x32xf32>, vector<32x32xf32> -> vector<32x32xf32>
    %123 = arith.addf %101, %122 : vector<32x32xf32>
    %c0_52 = arith.constant 0 : index
    %c0_53 = arith.constant 0 : index
    %c0_54 = arith.constant 0 : index
    %124 = vector.load %arg11[%c0_52, %c0_53, %c0_54] : memref<1x1x32xf32, #tpu.memory_space<vmem>>, vector<1x1x32xf32>
    %125 = vector.shape_cast %124 : vector<1x1x32xf32> to vector<1x32xf32>
    %126 = vector.broadcast %125 : vector<1x32xf32> to vector<32x32xf32>
    %127 = arith.addf %123, %126 : vector<32x32xf32>
    %128 = arith.addf %3, %127 : vector<32x32xf32>
    %cst_55 = arith.constant dense<0.000000e+00> : vector<32xf32>
    %129 = vector.multi_reduction <add>, %128, %cst_55 [1] : vector<32x32xf32> to vector<32xf32>
    %130 = vector.shape_cast %129 : vector<32xf32> to vector<32x1xf32>
    %cst_56 = arith.constant 3.200000e+01 : f32
    %131 = vector.broadcast %cst_56 : f32 to vector<32x1xf32>
    %132 = arith.divf %130, %131 : vector<32x1xf32>
    %133 = vector.broadcast %132 : vector<32x1xf32> to vector<32x32xf32>
    %134 = arith.subf %128, %133 : vector<32x32xf32>
    %135 = arith.mulf %134, %134 : vector<32x32xf32>
    %cst_57 = arith.constant dense<0.000000e+00> : vector<32xf32>
    %136 = vector.multi_reduction <add>, %135, %cst_57 [1] : vector<32x32xf32> to vector<32xf32>
    %137 = vector.shape_cast %136 : vector<32xf32> to vector<32x1xf32>
    %cst_58 = arith.constant 3.200000e+01 : f32
    %138 = vector.broadcast %cst_58 : f32 to vector<32x1xf32>
    %139 = arith.divf %137, %138 : vector<32x1xf32>
    %140 = vector.broadcast %132 : vector<32x1xf32> to vector<32x32xf32>
    %141 = arith.subf %128, %140 : vector<32x32xf32>
    %cst_59 = arith.constant 9.99999974E-6 : f32
    %142 = vector.broadcast %cst_59 : f32 to vector<32x1xf32>
    %143 = arith.addf %139, %142 : vector<32x1xf32>
    %144 = math.rsqrt %143 : vector<32x1xf32>
    %145 = vector.broadcast %144 : vector<32x1xf32> to vector<32x32xf32>
    %146 = arith.mulf %141, %145 : vector<32x32xf32>
    %c0_60 = arith.constant 0 : index
    %c0_61 = arith.constant 0 : index
    %c0_62 = arith.constant 0 : index
    %147 = vector.load %arg12[%c0_60, %c0_61, %c0_62] : memref<1x1x32xf32, #tpu.memory_space<vmem>>, vector<1x1x32xf32>
    %148 = vector.shape_cast %147 : vector<1x1x32xf32> to vector<1x32xf32>
    %149 = vector.broadcast %148 : vector<1x32xf32> to vector<32x32xf32>
    %150 = arith.mulf %146, %149 : vector<32x32xf32>
    %c0_63 = arith.constant 0 : index
    %c0_64 = arith.constant 0 : index
    %c0_65 = arith.constant 0 : index
    %151 = vector.load %arg13[%c0_63, %c0_64, %c0_65] : memref<1x1x32xf32, #tpu.memory_space<vmem>>, vector<1x1x32xf32>
    %152 = vector.shape_cast %151 : vector<1x1x32xf32> to vector<1x32xf32>
    %153 = vector.broadcast %152 : vector<1x32xf32> to vector<32x32xf32>
    %154 = arith.addf %150, %153 : vector<32x32xf32>
    %c0_66 = arith.constant 0 : index
    %c0_67 = arith.constant 0 : index
    %c0_68 = arith.constant 0 : index
    %155 = vector.load %arg14[%c0_66, %c0_67, %c0_68] : memref<1x32x64xf32, #tpu.memory_space<vmem>>, vector<1x32x64xf32>
    %156 = vector.shape_cast %155 : vector<1x32x64xf32> to vector<32x64xf32>
    %cst_69 = arith.constant dense<0.000000e+00> : vector<32x64xf32>
    %157 = tpu.matmul %154, %156, %cst_69 {dimension_numbers = #tpu.dot_dimension_numbers<[1], [0], [0], [1], [0, 0, 1, 1], [], []>} : vector<32x32xf32>, vector<32x64xf32>, vector<32x64xf32> -> vector<32x64xf32>
    %c0_70 = arith.constant 0 : index
    %c0_71 = arith.constant 0 : index
    %c0_72 = arith.constant 0 : index
    %158 = vector.load %arg15[%c0_70, %c0_71, %c0_72] : memref<1x1x64xf32, #tpu.memory_space<vmem>>, vector<1x1x64xf32>
    %159 = vector.shape_cast %158 : vector<1x1x64xf32> to vector<1x64xf32>
    %160 = vector.broadcast %159 : vector<1x64xf32> to vector<32x64xf32>
    %161 = arith.addf %157, %160 : vector<32x64xf32>
    %cst_73 = arith.constant 0.000000e+00 : f32
    %162 = vector.broadcast %cst_73 : f32 to vector<32x64xf32>
    %163 = arith.maximumf %161, %162 : vector<32x64xf32>
    %c0_74 = arith.constant 0 : index
    %c0_75 = arith.constant 0 : index
    %c0_76 = arith.constant 0 : index
    %164 = vector.load %arg16[%c0_74, %c0_75, %c0_76] : memref<1x64x32xf32, #tpu.memory_space<vmem>>, vector<1x64x32xf32>
    %165 = vector.shape_cast %164 : vector<1x64x32xf32> to vector<64x32xf32>
    %cst_77 = arith.constant dense<0.000000e+00> : vector<32x32xf32>
    %166 = tpu.matmul %163, %165, %cst_77 {dimension_numbers = #tpu.dot_dimension_numbers<[1], [0], [0], [1], [0, 0, 1, 1], [], []>} : vector<32x64xf32>, vector<64x32xf32>, vector<32x32xf32> -> vector<32x32xf32>
    %c0_78 = arith.constant 0 : index
    %c0_79 = arith.constant 0 : index
    %c0_80 = arith.constant 0 : index
    %167 = vector.load %arg17[%c0_78, %c0_79, %c0_80] : memref<1x1x32xf32, #tpu.memory_space<vmem>>, vector<1x1x32xf32>
    %168 = vector.shape_cast %167 : vector<1x1x32xf32> to vector<1x32xf32>
    %169 = vector.broadcast %168 : vector<1x32xf32> to vector<32x32xf32>
    %170 = arith.addf %166, %169 : vector<32x32xf32>
    %171 = arith.addf %154, %170 : vector<32x32xf32>
    %cst_81 = arith.constant dense<0.000000e+00> : vector<32xf32>
    %172 = vector.multi_reduction <add>, %171, %cst_81 [1] : vector<32x32xf32> to vector<32xf32>
    %173 = vector.shape_cast %172 : vector<32xf32> to vector<32x1xf32>
    %cst_82 = arith.constant 3.200000e+01 : f32
    %174 = vector.broadcast %cst_82 : f32 to vector<32x1xf32>
    %175 = arith.divf %173, %174 : vector<32x1xf32>
    %176 = vector.broadcast %175 : vector<32x1xf32> to vector<32x32xf32>
    %177 = arith.subf %171, %176 : vector<32x32xf32>
    %178 = arith.mulf %177, %177 : vector<32x32xf32>
    %cst_83 = arith.constant dense<0.000000e+00> : vector<32xf32>
    %179 = vector.multi_reduction <add>, %178, %cst_83 [1] : vector<32x32xf32> to vector<32xf32>
    %180 = vector.shape_cast %179 : vector<32xf32> to vector<32x1xf32>
    %cst_84 = arith.constant 3.200000e+01 : f32
    %181 = vector.broadcast %cst_84 : f32 to vector<32x1xf32>
    %182 = arith.divf %180, %181 : vector<32x1xf32>
    %183 = vector.broadcast %175 : vector<32x1xf32> to vector<32x32xf32>
    %184 = arith.subf %171, %183 : vector<32x32xf32>
    %cst_85 = arith.constant 9.99999974E-6 : f32
    %185 = vector.broadcast %cst_85 : f32 to vector<32x1xf32>
    %186 = arith.addf %182, %185 : vector<32x1xf32>
    %187 = math.rsqrt %186 : vector<32x1xf32>
    %188 = vector.broadcast %187 : vector<32x1xf32> to vector<32x32xf32>
    %189 = arith.mulf %184, %188 : vector<32x32xf32>
    %c0_86 = arith.constant 0 : index
    %c0_87 = arith.constant 0 : index
    %c0_88 = arith.constant 0 : index
    %190 = vector.load %arg18[%c0_86, %c0_87, %c0_88] : memref<1x1x32xf32, #tpu.memory_space<vmem>>, vector<1x1x32xf32>
    %191 = vector.shape_cast %190 : vector<1x1x32xf32> to vector<1x32xf32>
    %192 = vector.broadcast %191 : vector<1x32xf32> to vector<32x32xf32>
    %193 = arith.mulf %189, %192 : vector<32x32xf32>
    %c0_89 = arith.constant 0 : index
    %c0_90 = arith.constant 0 : index
    %c0_91 = arith.constant 0 : index
    %194 = vector.load %arg19[%c0_89, %c0_90, %c0_91] : memref<1x1x32xf32, #tpu.memory_space<vmem>>, vector<1x1x32xf32>
    %195 = vector.shape_cast %194 : vector<1x1x32xf32> to vector<1x32xf32>
    %196 = vector.broadcast %195 : vector<1x32xf32> to vector<32x32xf32>
    %197 = arith.addf %193, %196 : vector<32x32xf32>
    %c0_92 = arith.constant 0 : index
    %c0_93 = arith.constant 0 : index
    %198 = vector.load %arg21[%c0_92, %c0_93] : memref<32x32xf32, #tpu.memory_space<vmem>>, vector<32x32xf32>
    tpu.vector_store %arg21[%c0_92, %c0_93], %197 {strides = array<i32>} : memref<32x32xf32, #tpu.memory_space<vmem>>, vector<32x32xf32>,
    %c1_i32 = arith.constant 1 : i32
    %199 = arith.cmpi eq, %arg1, %c1_i32 : i32
    %200 = arith.extui %199 : i1 to i32
    %c0_i32_94 = arith.constant 0 : i32
    %201 = arith.cmpi ne, %200, %c0_i32_94 : i32
    scf.if %201 {
      %202 = vector.shape_cast %197 : vector<32x32xf32> to vector<2x16x32xf32>
      %c0_95 = arith.constant 0 : index
      %c0_96 = arith.constant 0 : index
      %c0_97 = arith.constant 0 : index
      %203 = vector.load %arg20[%c0_95, %c0_96, %c0_97] : memref<2x16x32xf32, #tpu.memory_space<vmem>>, vector<2x16x32xf32>
      tpu.vector_store %arg20[%c0_95, %c0_96, %c0_97], %202 {strides = array<i32>} : memref<2x16x32xf32, #tpu.memory_space<vmem>>, vector<2x16x32xf32>,
    } else {
    }
    return
  }
  func.func @transform_0(%arg0: i32, %arg1: i32) -> (i32, i32, i32) {
    %c0_i32 = arith.constant 0 : i32
    %c0_i32_0 = arith.constant 0 : i32
    %c0_i32_1 = arith.constant 0 : i32
    return %arg0, %c0_i32, %c0_i32_0 : i32, i32, i32
  }
  func.func @transform_1(%arg0: i32, %arg1: i32) -> (i32, i32, i32) {
    %c0_i32 = arith.constant 0 : i32
    %c0_i32_0 = arith.constant 0 : i32
    %c0_i32_1 = arith.constant 0 : i32
    return %arg0, %c0_i32, %c0_i32_0 : i32, i32, i32
  }
  func.func @transform_2(%arg0: i32, %arg1: i32) -> (i32, i32, i32) {
    %c0_i32 = arith.constant 0 : i32
    %c0_i32_0 = arith.constant 0 : i32
    %c0_i32_1 = arith.constant 0 : i32
    return %arg1, %c0_i32, %c0_i32_0 : i32, i32, i32
  }
  func.func @transform_3(%arg0: i32, %arg1: i32) -> (i32, i32, i32) {
    %c0_i32 = arith.constant 0 : i32
    %c0_i32_0 = arith.constant 0 : i32
    %c0_i32_1 = arith.constant 0 : i32
    return %arg1, %c0_i32, %c0_i32_0 : i32, i32, i32
  }
  func.func @transform_4(%arg0: i32, %arg1: i32) -> (i32, i32, i32) {
    %c0_i32 = arith.constant 0 : i32
    %c0_i32_0 = arith.constant 0 : i32
    %c0_i32_1 = arith.constant 0 : i32
    return %arg1, %c0_i32, %c0_i32_0 : i32, i32, i32
  }
  func.func @transform_5(%arg0: i32, %arg1: i32) -> (i32, i32, i32) {
    %c0_i32 = arith.constant 0 : i32
    %c0_i32_0 = arith.constant 0 : i32
    %c0_i32_1 = arith.constant 0 : i32
    return %arg1, %c0_i32, %c0_i32_0 : i32, i32, i32
  }
  func.func @transform_6(%arg0: i32, %arg1: i32) -> (i32, i32, i32) {
    %c0_i32 = arith.constant 0 : i32
    %c0_i32_0 = arith.constant 0 : i32
    %c0_i32_1 = arith.constant 0 : i32
    return %arg1, %c0_i32, %c0_i32_0 : i32, i32, i32
  }
  func.func @transform_7(%arg0: i32, %arg1: i32) -> (i32, i32, i32) {
    %c0_i32 = arith.constant 0 : i32
    %c0_i32_0 = arith.constant 0 : i32
    %c0_i32_1 = arith.constant 0 : i32
    return %arg1, %c0_i32, %c0_i32_0 : i32, i32, i32
  }
  func.func @transform_8(%arg0: i32, %arg1: i32) -> (i32, i32, i32, i32) {
    %c0_i32 = arith.constant 0 : i32
    %c0_i32_0 = arith.constant 0 : i32
    %c0_i32_1 = arith.constant 0 : i32
    %c0_i32_2 = arith.constant 0 : i32
    return %arg1, %c0_i32, %c0_i32_0, %c0_i32_1 : i32, i32, i32, i32
  }
  func.func @transform_9(%arg0: i32, %arg1: i32) -> (i32, i32, i32) {
    %c0_i32 = arith.constant 0 : i32
    %c0_i32_0 = arith.constant 0 : i32
    %c0_i32_1 = arith.constant 0 : i32
    return %arg1, %c0_i32, %c0_i32_0 : i32, i32, i32
  }
  func.func @transform_10(%arg0: i32, %arg1: i32) -> (i32, i32, i32) {
    %c0_i32 = arith.constant 0 : i32
    %c0_i32_0 = arith.constant 0 : i32
    %c0_i32_1 = arith.constant 0 : i32
    return %arg1, %c0_i32, %c0_i32_0 : i32, i32, i32
  }
  func.func @transform_11(%arg0: i32, %arg1: i32) -> (i32, i32, i32) {
    %c0_i32 = arith.constant 0 : i32
    %c0_i32_0 = arith.constant 0 : i32
    %c0_i32_1 = arith.constant 0 : i32
    return %arg1, %c0_i32, %c0_i32_0 : i32, i32, i32
  }
  func.func @transform_12(%arg0: i32, %arg1: i32) -> (i32, i32, i32) {
    %c0_i32 = arith.constant 0 : i32
    %c0_i32_0 = arith.constant 0 : i32
    %c0_i32_1 = arith.constant 0 : i32
    return %arg1, %c0_i32, %c0_i32_0 : i32, i32, i32
  }
  func.func @transform_13(%arg0: i32, %arg1: i32) -> (i32, i32, i32) {
    %c0_i32 = arith.constant 0 : i32
    %c0_i32_0 = arith.constant 0 : i32
    %c0_i32_1 = arith.constant 0 : i32
    return %arg1, %c0_i32, %c0_i32_0 : i32, i32, i32
  }
  func.func @transform_14(%arg0: i32, %arg1: i32) -> (i32, i32, i32) {
    %c0_i32 = arith.constant 0 : i32
    %c0_i32_0 = arith.constant 0 : i32
    %c0_i32_1 = arith.constant 0 : i32
    return %arg1, %c0_i32, %c0_i32_0 : i32, i32, i32
  }
  func.func @transform_15(%arg0: i32, %arg1: i32) -> (i32, i32, i32) {
    %c0_i32 = arith.constant 0 : i32
    %c0_i32_0 = arith.constant 0 : i32
    %c0_i32_1 = arith.constant 0 : i32
    return %arg1, %c0_i32, %c0_i32_0 : i32, i32, i32
  }
  func.func @transform_16(%arg0: i32, %arg1: i32) -> (i32, i32, i32) {
    %c0_i32 = arith.constant 0 : i32
    %c0_i32_0 = arith.constant 0 : i32
    %c0_i32_1 = arith.constant 0 : i32
    return %arg1, %c0_i32, %c0_i32_0 : i32, i32, i32
  }
  func.func @transform_17(%arg0: i32, %arg1: i32) -> (i32, i32, i32) {
    %c0_i32 = arith.constant 0 : i32
    %c0_i32_0 = arith.constant 0 : i32
    %c0_i32_1 = arith.constant 0 : i32
    return %arg1, %c0_i32, %c0_i32_0 : i32, i32, i32
  }
  func.func @transform_18(%arg0: i32, %arg1: i32) -> (i32, i32, i32) {
    %c0_i32 = arith.constant 0 : i32
    %c0_i32_0 = arith.constant 0 : i32
    %c0_i32_1 = arith.constant 0 : i32
    return %arg0, %c0_i32, %c0_i32_0 : i32, i32, i32
  }
}

</mosaic_0001>

<bundles_post_ra>
// kernel: tpu_custom_call.1
= control target key start
LH: loop header
LB: loop body
LE: loop exit
PB: predicated region body
PF: predicated region fallthrough
CT: control target
= control target key end

     0   :  { %s5753_s0 = inlined_call_operand.hbm [shape: f32[2,16,32], index: 0, kind: input, shape index: {}]   ;;  %s5754_s1 = inlined_call_operand.hbm [shape: f32[2,16,32], index: 1, kind: input, shape index: {}]   ;;  %s5755_s2 = inlined_call_operand.vmem [shape: f32[2,32,32], index: 2, kind: input, shape index: {}]   ;;  %s5756_s3 = inlined_call_operand.vmem [shape: f32[2,32,32], index: 3, kind: input, shape index: {}]   ;;  %s5757_s4 = inlined_call_operand.vmem [shape: f32[2,32,32], index: 4, kind: input, shape index: {}]   ;;  %s5758_s5 = inlined_call_operand.vmem [shape: f32[2,1,32], index: 5, kind: input, shape index: {}]   ;;  %s5759_s6 = inlined_call_operand.vmem [shape: f32[2,1,32], index: 6, kind: input, shape index: {}]   ;;  %s5760_s7 = inlined_call_operand.vmem [shape: f32[2,1,32], index: 7, kind: input, shape index: {}]   ;;  %s5761_s8 = inlined_call_operand.hbm [shape: f32[2,4,8,32], index: 8, kind: input, shape index: {}]   ;;  %s5762_s9 = inlined_call_operand.vmem [shape: f32[2,1,32], index: 9, kind: input, shape index: {}]   ;;  %s5763_s10 = inlined_call_operand.vmem [shape: f32[2,1,32], index: 10, kind: input, shape index: {}]   ;;  %s5764_s11 = inlined_call_operand.vmem [shape: f32[2,1,32], index: 11, kind: input, shape index: {}]   ;;  %s5765_s12 = inlined_call_operand.hbm [shape: f32[2,32,64], index: 12, kind: input, shape index: {}]   ;;  %s5766_s13 = inlined_call_operand.vmem [shape: f32[2,1,64], index: 13, kind: input, shape index: {}]   ;;  %s5767_s14 = inlined_call_operand.vmem [shape: f32[2,64,32], index: 14, kind: input, shape index: {}]   ;;  %s5768_s15 = inlined_call_operand.vmem [shape: f32[2,1,32], index: 15, kind: input, shape index: {}]   ;;  %s5769_s16 = inlined_call_operand.vmem [shape: f32[2,1,32], index: 16, kind: input, shape index: {}]   ;;  %s5770_s17 = inlined_call_operand.vmem [shape: f32[2,1,32], index: 17, kind: input, shape index: {}]   ;;  %s5771_s18 = inlined_call_operand.hbm [shape: f32[2,16,32], index: 18, kind: output, shape index: {}]  }
   0x1   :  { %5796 = sst [smem:[#allocation22_spill]] %s5753_s0 }
   0x2   :  { %5797 = sst [smem:[#allocation23_spill]] %s5754_s1 }
   0x3   :  { %5798 = sst [smem:[#allocation24_spill]] %s5755_s2 }
   0x4   :  { %5799 = sst [smem:[#allocation25_spill]] %s5756_s3 }
   0x5   :  { %5800 = sst [smem:[#allocation26_spill]] %s5757_s4 }
   0x6   :  { %5801 = sst [smem:[#allocation27_spill]] %s5760_s7 }
   0x7   :  { %5802 = sst [smem:[#allocation28_spill]] %s5761_s8 }
   0x8   :  { %5803 = sst [smem:[#allocation29_spill]] %s5762_s9 }
   0x9   :  { %5804 = sst [smem:[#allocation30_spill]] %s5763_s10 }
   0xa   :  { %5805 = sst [smem:[#allocation31_spill]] %s5764_s11 }
   0xb   :  { %5806 = sst [smem:[#allocation32_spill]] %s5765_s12 }
   0xc   :  { %5807 = sst [smem:[#allocation33_spill]] %s5766_s13 }
   0xd   :  { %5808 = sst [smem:[#allocation34_spill]] %s5767_s14 }
   0xe   :  { %5809 = sst [smem:[#allocation35_spill]] %s5768_s15 }
   0xf   :  { %5810 = sst [smem:[#allocation36_spill]] %s5769_s16 }
  0x10   :  { %5811 = sst [smem:[#allocation37_spill]] %s5770_s17 }
  0x11   :  { %5812 = sst [smem:[#allocation38_spill]] %s5771_s18 }
  0x12   :  { %23 = vsyncpa [#allocation4], 0 }
  0x13   :  { %24 = vsyncpa [#allocation7], 0 }
  0x14   :  { %25 = vsyncpa [#allocation5], 0  ;;  %s5076_s27 = smov 0   ;;  %s5078_s28 = smov 0  }
  0x15   :  { %s5080_s29 = smov 0   ;;  %s5082_s30 = smov 0  }
  0x16   :  { %s5084_s0 = smov 0   ;;  %s5086_s19 = smov 0  }
  0x17 LB: > { %5813 = sst [smem:[#allocation15_spill]] %s4951_s28  ;;  %s5105_s1 = sadd.s32 4294967295, %s4967_s19   ;;  %s4967_s19 = sphi %s5086_s19, %s31_s19   ;;  %s4963_s0 = sphi %s5084_s0, %s5878_s0   ;;  %s4959_s30 = sphi %s5082_s30, %s5877_s30   ;;  %s4955_s29 = sphi %s5080_s29, %s5876_s29   ;;  %s4951_s28 = sphi %s5078_s28, %s5875_s28   ;;  %s4947_s27 = sphi %s5076_s27, %s5874_s27  }
  0x18   : > { %5814 = sst [smem:[#allocation16_spill]] %s4955_s29  ;;  %p265_p0 = scmp.ne.s32.totalorder %s4955_s29, %s4951_s28 }
  0x19   : > { %5815 = sst [smem:[#allocation17_spill]] %s4963_s0  ;;  %p266_p1 = scmp.eq.s32.totalorder %s4967_s19, 0 }
  0x1a   : > { %5816 = sst [smem:[#allocation18_spill]] %s4967_s19  ;;  %p271_p2 = scmp.ne.s32.totalorder %s4951_s28, %s4947_s27 }
  0x1b   : > { %5817 = sst [smem:[#allocation19_spill]] %s5105_s1  ;;  %p5775_p3 = scmp.eq.s32.totalorder %s5105_s1, 0 }
  0x1c   : > { %p267_p4 = por %p266_p1, %p265_p0  ;;  %p3905_p5 = scmp.ge.s32.totalorder %s4967_s19, 1 }
  0x1d   : > { %p5116_p6 = por %p5775_p3, %p271_p2  ;;  %p542_p7 = scmp.lt.s32.totalorder %s4967_s19, 3 }
  0x1e   : > { %s4969_s2 = smov [#allocation3]   ;;  %p4556_p10 = scmp.lt.s32.totalorder %s4967_s19, 2 }
  0x1f   : > { %s5818_s21 = scalar_select %p5116_p6, 1, 0 }
  0x20   : > { %p5121_p8 = pnand %p3905_p5, %p542_p7  ;;  %s558_s23 = sshll.u32 %s4969_s2, 4  ;;  %s559_s23 = int_to_ptr.vmem [resolvable:$true] %s558_s23 }
  0x21   : > { %p5134_p12 = pnand %p4556_p10, %p267_p4  ;;  %s40_s26 = sadd.s32 1, %s4963_s0 }
  0x22   : > { %s5819_s22 = scalar_select %p5121_p8, 1, 0 }
  0x23   : > { %p4540_p9 = pneg %p5121_p8  ;;  %s5822_s18 = sld [smem:[#allocation22_spill]] }
  0x24   : > { %s5821_s25 = scalar_select %p5134_p12, 1, 0 }
  0x25   : > { %p5130_p11 = pnand %p4540_p9, %p5775_p3 }
  0x27   : > { %p5785_p0 = pneg %p5130_p11 }
  0x29   : > { %s4763_s2 = scalar_lea.hbm %s5822_s18, 512 }
  0x2a   : > { %p4764_p13 = scmp.ne.s32.totalorder %s5822_s18, %s4763_s2  ;;  %p4770_p4 = scmp.lt.u32.totalorder %s4763_s2, %s5822_s18 }
  0x2c   : > { %p4766_p1 = pnand %p5785_p0, %p4764_p13 }
  0x2e   : > { %p4767_p2 = pneg %p4766_p1 }
  0x30   : > { %p4772_p5 = pnand %p4770_p4, %p4767_p2 }
  0x32   : > { %4775 = shalt.err (!%p4772_p5)
}
  0x33   : > { %s4776_s13 = scalar_lea.vmem %s559_s23, 512  ;;  %p4784_p3 = scmp.lt.s32.totalorder %s559_s23, %s559_s23 }
  0x34   : > { %p4777_p7 = scmp.ne.s32.totalorder %s559_s23, %s4776_s13  ;;  %p4785_p6 = scmp.lt.s32.totalorder %s4776_s13, %s4776_s13 }
  0x36   : > { %p4779_p9 = pnand %p4777_p7, %p5785_p0  ;;  %p4786_p8 = por %p4785_p6, %p4784_p3 }
  0x38   : > { %p4780_p10 = pneg %p4779_p9 }
  0x3a   : > { %p4787_p12 = pnand %p4786_p8, %p4780_p10 }
  0x3c   : > { %4790 = shalt.err (!%p4787_p12)
}
  0x3d   : > { %s5779_s16 = smov 128   ;;  %s5781_s14 = smov 8  }
  0x3e   : > { %4543 = dma.hbm_to_vmem [thread:$0]  (!%p5130_p11), %s5822_s18, 512, %s559_s23, [#allocation4], %s5779_s16, %s5779_s16, %s5781_s14  }
  0x3f   : > { %p41_p3 = scmp.ge.s32.totalorder %s40_s26, 2  ;;  %s631_s13 = sand.u32 1, %s4967_s19  }
  0x40   : > { %s633_s20 = sand.u32 1, %s4955_s29   ;;  %s5783_s11 = sshll.u32 %s4963_s0, 9 }
  0x41   : > { %s5880_s26 = smov (%p41_p3, %s40_s26), 0  ;;  %s5168_s27 = sshll.u32 %s633_s20, 5 }
  0x42   : > { %5823 = sst [smem:[#allocation20_spill]] %s5880_s26  ;;  %s255_s2 = ssub.s32 %s4963_s0, %s5880_s26 }
  0x43   : > { %p256_p6 = scmp.eq.s32.totalorder %s255_s2, 0  ;;  %s5824_s8 = sld [smem:[#allocation28_spill]] }
  0x44   : > { %s635_s23 = scalar_lea.vmem [#allocation8], %s5168_s27  ;;  %s5825_s16 = sadd.s32 1, %s4955_s29 }
  0x45   : > { %s642_s17 = sshll.u32 %s635_s23, 4  ;;  %s5188_s20 = scalar_lea.sflag [#allocation4], %s631_s13  ;;  %s5186_s17 = int_to_ptr.vmem [resolvable:$true] %s642_s17 }
  0x46   : > { %s5184_s14 = scalar_select %p256_p6, %s4955_s29, %s5825_s16  }
  0x47   : > { %p5827_p12 = scmp.ne.s32.totalorder %s5821_s25, 0 }
  0x48   : > { %5826 = sst [smem:[#allocation21_spill]] %s5184_s14 }
  0x49   : > { %s5178_s15 = scalar_lea.hbm %s5824_s8, %s5783_s11  ;;  %p5789_p13 = pneg %p5827_p12 }
  0x4a   : > { %s4791_s2 = scalar_lea.hbm %s5178_s15, 512  ;;  %s4796_s11 = scalar_lea.hbm %s5824_s8, 1024 }
  0x4b   : > { %p4792_p8 = scmp.ne.s32.totalorder %s5178_s15, %s4791_s2  ;;  %p4797_p4 = scmp.lt.u32.totalorder %s5178_s15, %s5824_s8 }
  0x4c   : > { %p4798_p5 = scmp.lt.u32.totalorder %s4796_s11, %s4791_s2  ;;  %p4800_p9 = scmp.lt.u32.totalorder %s4791_s2, %s5178_s15 }
  0x4d   : > { %p4794_p1 = pnand %p5789_p13, %p4792_p8 }
  0x4e   : > { %p4799_p7 = por %p4798_p5, %p4797_p4 }
  0x4f   : > { %p4795_p2 = pneg %p4794_p1 }
  0x50   : > { %p4801_p10 = por %p4800_p9, %p4799_p7 }
  0x52   : > { %p4802_p3 = pnand %p4801_p10, %p4795_p2 }
  0x54   : > { %4805 = shalt.err (!%p4802_p3)
}
  0x55   : > { %s4806_s16 = scalar_lea.vmem %s5186_s17, 512  ;;  %s4972_s13 = smov [#allocation8]  }
  0x56   : > { %p4807_p6 = scmp.ne.s32.totalorder %s5186_s17, %s4806_s16  ;;  %s4811_s9 = sshll.u32 %s4972_s13, 4  ;;  %s4812_s9 = int_to_ptr.vmem [resolvable:$false] %s4811_s9 }
  0x57   : > { %s4813_s18 = scalar_lea.vmem %s4812_s9, 1024  ;;  %p4814_p0 = scmp.lt.s32.totalorder %s5186_s17, %s4812_s9 }
  0x58   : > { %p4809_p8 = pnand %p4807_p6, %p5789_p13  ;;  %p4815_p4 = scmp.lt.s32.totalorder %s4813_s18, %s4806_s16 }
  0x5a   : > { %p4810_p1 = pneg %p4809_p8  ;;  %p4816_p5 = por %p4815_p4, %p4814_p0 }
  0x5c   : > { %p4817_p7 = pnand %p4816_p5, %p4810_p1 }
  0x5e   : > { %4820 = shalt.err (!%p4817_p7)
}
  0x5f   : > { %s5828_s11 = smov 8   ;;  %s5829_s2 = smov 128  }
  0x60   : > { %4550 = dma.hbm_to_vmem [thread:$0]  (!%p5827_p12), %s5178_s15, 512, %s5186_s17, %s5188_s20, %s5829_s2, %s5829_s2, %s5828_s11  }
  0x61   : > { %s4973_s10 = smov [#allocation6]   ;;  %s5830_s13 = sshll.u32 %s4963_s0, 9 }
  0x62   : > { %s575_s23 = sshll.u32 %s4973_s10, 4  ;;  %s5831_s12 = sld [smem:[#allocation32_spill]]  ;;  %s576_s23 = int_to_ptr.vmem [resolvable:$true] %s575_s23 }
  0x63   : > { %s5832_s14 = sld [smem:[#allocation23_spill]]  ;;  %p5833_p2 = pneg %p5130_p11 }
  0x68   : > { %s5224_s18 = scalar_lea.hbm %s5831_s12, %s5830_s13 }
  0x69   : > { %s4821_s29 = scalar_lea.hbm %s5832_s14, 512 }
  0x6a   : > { %p4822_p0 = scmp.ne.s32.totalorder %s5832_s14, %s4821_s29  ;;  %p4828_p3 = scmp.lt.u32.totalorder %s4821_s29, %s5832_s14 }
  0x6c   : > { %p4824_p9 = pnand %p4822_p0, %p5833_p2 }
  0x6e   : > { %p4825_p10 = pneg %p4824_p9 }
  0x70   : > { %p4830_p6 = pnand %p4828_p3, %p4825_p10 }
  0x72   : > { %4833 = shalt.err (!%p4830_p6)
}
  0x73   : > { %s4834_s10 = scalar_lea.vmem %s576_s23, 512  ;;  %p5834_p1 = pmov %p5833_p2 }
  0x74   : > { %p4835_p8 = scmp.ne.s32.totalorder %s576_s23, %s4834_s10  ;;  %p4842_p7 = scmp.lt.s32.totalorder %s576_s23, %s576_s23 }
  0x75   : > { %p4843_p13 = scmp.lt.s32.totalorder %s4834_s10, %s4834_s10 }
  0x76   : > { %p4837_p4 = pnand %p4835_p8, %p5834_p1 }
  0x77   : > { %p4844_p12 = por %p4843_p13, %p4842_p7 }
  0x78   : > { %p4838_p5 = pneg %p4837_p4 }
  0x7a   : > { %p4845_p0 = pnand %p4844_p12, %p4838_p5 }
  0x7c   : > { %4848 = shalt.err (!%p4845_p0)
}
  0x7d   : > { %4546 = dma.hbm_to_vmem [thread:$0]  (!%p5130_p11), %s5832_s14, 512, %s576_s23, [#allocation7], %s5829_s2, %s5829_s2, %s5828_s11  }
  0x7e   : > { %s674_s29 = scalar_lea.vmem [#allocation9], %s5168_s27  ;;  %s4849_s26 = scalar_lea.hbm %s5224_s18, 512 }
  0x7f   : > { %s681_s19 = sshll.u32 %s674_s29, 4  ;;  %p4850_p12 = scmp.ne.s32.totalorder %s5224_s18, %s4849_s26  ;;  %s5250_s19 = int_to_ptr.vmem [resolvable:$true] %s681_s19 }
  0x80   : > { %p5835_p13 = scmp.ne.s32.totalorder %s5821_s25, 0  ;;  %s4854_s9 = scalar_lea.hbm %s5831_s12, 1024 }
  0x81   : > { %p4855_p3 = scmp.lt.u32.totalorder %s5224_s18, %s5831_s12  ;;  %p4856_p6 = scmp.lt.u32.totalorder %s4854_s9, %s4849_s26 }
  0x82   : > { %p5836_p2 = pneg %p5835_p13  ;;  %p4858_p8 = scmp.lt.u32.totalorder %s4849_s26, %s5224_s18 }
  0x83   : > { %p4857_p11 = por %p4856_p6, %p4855_p3 }
  0x84   : > { %p4852_p9 = pnand %p4850_p12, %p5836_p2 }
  0x85   : > { %p4859_p1 = por %p4858_p8, %p4857_p11 }
  0x86   : > { %p4853_p10 = pneg %p4852_p9 }
  0x88   : > { %p4860_p4 = pnand %p4859_p1, %p4853_p10 }
  0x8a   : > { %4863 = shalt.err (!%p4860_p4)
}
  0x8b   : > { %s4864_s27 = scalar_lea.vmem %s5250_s19, 512  ;;  %p5837_p7 = pmov %p5836_p2 }
  0x8c   : > { %p4865_p5 = scmp.ne.s32.totalorder %s5250_s19, %s4864_s27  ;;  %s4974_s23 = smov [#allocation9]  }
  0x8d   : > { %s4869_s17 = sshll.u32 %s4974_s23, 4  ;;  %s4870_s17 = int_to_ptr.vmem [resolvable:$false] %s4869_s17 }
  0x8e   : > { %p4867_p0 = pnand %p4865_p5, %p5837_p7  ;;  %s4871_s10 = scalar_lea.vmem %s4870_s17, 1024 }
  0x8f   : > { %p4872_p2 = scmp.lt.s32.totalorder %s5250_s19, %s4870_s17  ;;  %p4873_p9 = scmp.lt.s32.totalorder %s4871_s10, %s4864_s27 }
  0x90   : > { %p4868_p12 = pneg %p4867_p0 }
  0x91   : > { %p4874_p3 = por %p4873_p9, %p4872_p2 }
  0x93   : > { %p4875_p6 = pnand %p4874_p3, %p4868_p12 }
  0x95   : > { %4878 = shalt.err (!%p4875_p6)
}
  0x96   : > { %4553 = dma.hbm_to_vmem [thread:$0]  (!%p5835_p13), %s5224_s18, 512, %s5250_s19, %s5188_s20, %s5829_s2, %s5829_s2, %s5828_s11  }
  0x97   : > { %p5838_p10 = scmp.ne.s32.totalorder %s5819_s22, 0 }
  0x98   : > { %p5839_p11 = scmp.eq.s32.totalorder (!%p5838_p10), %s5105_s1, 0 }
  0x99   : > { %725 = sbr.rel (%p5838_p10) target bundleno = 4356 (0x1104), region = 92 }
  0xa0   : > { %4930 = dma.done.wait (%p5839_p11), [#allocation4], 512   ;;  %p5840_p8 = pmov %p5839_p11 }
  0xa2   : > { %4932 = vsyncadd (%p5840_p8), [#allocation4], 4294966784  ;;  %p5841_p1 = pmov %p5840_p8 }
  0xa4   : > { %4934 = dma.done.wait (%p5841_p1), [#allocation7], 512   ;;  %p5842_p4 = pmov %p5841_p1 }
  0xa5   : > { %s735_s25 = sand.u32 1, %s5105_s1   ;;  %s737_s20 = sand.u32 1, %s4951_s28  }
  0xa6   : > { %4936 = vsyncadd (%p5842_p4), [#allocation7], 4294966784  ;;  %s3918_s11 = sshll.u32 %s737_s20, 5  ;;  %s736_s22 = scalar_lea.sflag [#allocation4], %s735_s25 }
  0xa7   : > { %s5291_s2 = scalar_lea.vmem [#allocation8], %s3918_s11  ;;  %p5843_p13 = scmp.ne.s32.totalorder %s5818_s21, 0 }
  0xa9   : > { %4938 = dma.done.wait (%p5843_p13), %s736_s22, 1024  }
  0xaa   : > { %4940 = vsyncadd (%p5843_p13), %s736_s22, 4294966272  ;;  %p853_p5 = scmp.lt.s32.totalorder %s4959_s30, 1  ;;  %s5844_s24 = sld [smem:[#allocation24_spill]] }
  0xab   : > { %s5845_s3 = sld [smem:[#allocation25_spill]]  ;;  %s5846_s4 = sld [smem:[#allocation26_spill]] }
  0xac   : > { %s5299_s18 = scalar_select %p853_p5, %s4959_s30, 1 }
  0xad   : > { %s5847_s8 = sld [smem:[#allocation27_spill]]  ;;  %s5851_s10 = sld [smem:[#allocation33_spill]] }
  0xae   : > { %s4030_s7 = sshll.u32 %s5299_s18, 5  ;;  %s4033_s20 = sshll.u32 %s5299_s18, 6 }
  0xaf   : > { %s5852_s21 = sld [smem:[#allocation34_spill]]  ;;  %s5854_s16 = sld [smem:[#allocation36_spill]] }
  0xb0   : > { %s5309_s13 = scalar_lea.vmem %s5844_s24, %s4030_s7  ;;  %s5853_s24 = sld [smem:[#allocation35_spill]] }
  0xb1   : > { %s5314_s15 = scalar_lea.vmem %s5845_s3, %s4030_s7  ;;  %s5319_s17 = scalar_lea.vmem %s5846_s4, %s4030_s7 }
  0xb2   : > { %s5855_s7 = sld [smem:[#allocation37_spill]]  ;;  %s5363_s4 = scalar_lea.vmem [#allocation9], %s3918_s11 }
  0xb3   : > { %s876_s19 = scalar_lea.vmem %s5847_s8, %s5299_s18  ;;  %s888_s25 = scalar_lea.vmem %s5851_s10, %s5299_s18 }
  0xb4   : > { %p3928_p7 = scmp.ne.s32.totalorder %s4959_s30, 0 }
  0xb5   : > { %s5349_s8 = scalar_lea.vmem %s5852_s21, %s4033_s20  ;;  %s899_s14 = scalar_lea.vmem %s5854_s16, %s5299_s18  ;;  %v908_v0 = vld [vmem:[#allocation3] sm:$0xff] (!%p3928_p7)  ;;  %vm912_vm0 = vcmask (!%p3928_p7), 261120   ;;  %v909_v1 = vld [vmem:[#allocation3 + $0x8] sm:$0xff] (!%p3928_p7)  ;;  %v910_v2 = vld [vmem:[#allocation3 + $0x10] sm:$0xff] (!%p3928_p7) }
  0xb6   : > { %s896_s12 = scalar_lea.vmem %s5853_s24, %s5299_s18  ;;  %907 = sbr.rel (%p3928_p7) target bundleno = 189 (0xbd), region = 112  ;;  %913 = vst.msk [vmem:[#allocation2] sm:$0xff] (!%p3928_p7), %vm912_vm0, %v908_v0  ;;  %914 = vst.msk [vmem:[#allocation2 + $0x8] sm:$0xff] (!%p3928_p7), %vm912_vm0, %v909_v1  ;;  %v911_v3 = vld [vmem:[#allocation3 + $0x18] sm:$0xff] (!%p3928_p7) }
  0xb7   : > { %915 = vst.msk [vmem:[#allocation2 + $0x10] sm:$0xff] (!%p3928_p7), %vm912_vm0, %v910_v2  ;;  %916 = vst.msk [vmem:[#allocation2 + $0x18] sm:$0xff] (!%p3928_p7), %vm912_vm0, %v911_v3 }
  0xb8   : > { %s902_s23 = scalar_lea.vmem %s5855_s7, %s5299_s18 }
  0xbd PF: > { %v929_v4 = vld [vmem:[%s5309_s13] sm:$0xff]  ;;  %v930_v5 = vld [vmem:[%s5309_s13 + $0x8] sm:$0xff]  ;;  %v931_v6 = vld [vmem:[%s5309_s13 + $0x10] sm:$0xff]  ;;  %vm940_vm1 = vcmask 261120   ;;  %s5856_s11 = scalar_lea.vmem %s5758_s5, %s5299_s18  ;;  %vm1246_vm2 = vcmask 64512   ;;  %vm1425_vm4 = vcmask 130048  }
  0xbe   : > { %v4384_v7 = vpack.c.bf16 %v930_v5, %v929_v4  ;;  %v932_v8 = vld [vmem:[%s5309_s13 + $0x18] sm:$0xff]  ;;  %v917_v9 = vld [vmem:[#allocation2] sm:$0xff]  ;;  %v918_v14 = vld [vmem:[#allocation2 + $0x8] sm:$0xff]  ;;  %s4976_s21 = smov 112   ;;  %s4977_s26 = smov 104   ;;  %vm3461_vm5 = vcmask 523264  }
  0xbf   : > { %v921_v10 = vld [vmem:[#allocation6] sm:$0xff]  ;;  %v4388_v11 = vpack.c.bf16 %v932_v8, %v931_v6  ;;  %4198 = vmatprep.mubr.msk.f32.mxu0 %vm940_vm1, %v917_v9  ;;  %v1039_v15 = vld [vmem:[%s5314_s15 + $0x8] sm:$0xff]  ;;  %v919_v17 = vld [vmem:[#allocation2 + $0x10] sm:$0xff]  ;;  %s5861_s9 = sld [smem:[#allocation29_spill]]  ;;  %s5863_s0 = sld [smem:[#allocation30_spill]] }
  0xc0   : > { %v925_v12 = vadd.f32 %v921_v10, %v917_v9  ;;  %v1038_v13 = vld [vmem:[%s5314_s15] sm:$0xff]  ;;  %4385 = vmatprep.subr.bf16.mxu1 %v4384_v7  ;;  %v922_v16 = vld [vmem:[#allocation6 + $0x8] sm:$0xff]  ;;  %v923_v18 = vld [vmem:[#allocation6 + $0x10] sm:$0xff]  ;;  %s5865_s28 = sld [smem:[#allocation31_spill]]  ;;  %p4023_p0 = scmp.ne.s32.totalorder %s4959_s30, 1 }
  0xc1   : > { %4387 = vmatpush3.bf16.msra.mxu1 %v4384_v7  ;;  %v4392_v19 = vpack.c.bf16 %v1039_v15, %v1038_v13  ;;  %v1040_v20 = vld [vmem:[%s5314_s15 + $0x10] sm:$0xff]  ;;  %v1134_v21 = vld [vmem:[%s5319_s17] sm:$0xff]  ;;  %v1135_v22 = vld [vmem:[%s5319_s17 + $0x8] sm:$0xff]  ;;  %v926_v27 = vadd.f32 %v922_v16, %v918_v14  ;;  %v927_v29 = vadd.f32 %v923_v18, %v919_v17 }
  0xc2   : > { %4170 = vmatprep.mubr.msk.f32.mxu1 %vm940_vm1, %v925_v12  ;;  %4389 = vmatprep.subr.bf16.mxu1 %v4388_v11  ;;  %v1041_v23 = vld [vmem:[%s5314_s15 + $0x18] sm:$0xff]  ;;  %v4400_v24 = vpack.c.bf16 %v1135_v22, %v1134_v21  ;;  %v1136_v25 = vld [vmem:[%s5319_s17 + $0x10] sm:$0xff]  ;;  %v3929_v34 = vld [vmem:[%s5856_s11] ss:$0 sm:$0xff] }
  0xc3   : > { %v1137_v26 = vld [vmem:[%s5319_s17 + $0x18] sm:$0xff]  ;;  %v4396_v32 = vpack.c.bf16 %v1041_v23, %v1040_v20  ;;  %s5857_s17 = scalar_lea.vmem %s5759_s6, %s5299_s18  ;;  %vm5410_vm3 = vmpackc.low %vm1246_vm2, %vm1246_vm2  ;;  %v3939_v59 = vld [vmem:[%s876_s19] ss:$0 sm:$0xff]  ;;  %s4975_s19 = smov 120  }
  0xc4   : > { %v4404_v28 = vpack.c.bf16 %v1137_v26, %v1136_v25  ;;  %v920_v30 = vld [vmem:[#allocation2 + $0x18] sm:$0xff]  ;;  %4401 = vmatprep.subr.bf16.mxu0 %v4400_v24  ;;  %v3934_v41 = vld [vmem:[%s5857_s17] ss:$0 sm:$0xff] }
  0xc5   : > { %4391 = vmatpush3.bf16.msra.mxu1 %v4388_v11  ;;  %v924_v31 = vld [vmem:[#allocation6 + $0x18] sm:$0xff]  ;;  %4403 = vmatpush3.bf16.msra.mxu0 %v4400_v24  ;;  %s5862_s3 = scalar_lea.vmem %s5861_s9, %s5299_s18  ;;  %s5864_s27 = scalar_lea.vmem %s5863_s0, %s5299_s18 }
  0xc6   : > { %4393 = vmatprep.subr.bf16.mxu1 %v4392_v19  ;;  %4405 = vmatprep.subr.bf16.mxu0 %v4404_v28  ;;  %v928_v33 = vadd.f32 %v924_v31, %v920_v30  ;;  %s5866_s1 = scalar_lea.vmem %s5865_s28, %s5299_s18 }
  0xc8   : > { %4171 = vmatmul.mubr.msk.f32.vlgmr.msra.gmra.mrb[0].mxu1 %vm940_vm1, %v926_v27 }
  0xc9   : > { %4395 = vmatpush3.bf16.msra.mxu1 %v4392_v19  ;;  %4173 = vmatprep.mubr.msk.f32.mxu1 %vm940_vm1, %v927_v29 }
  0xca   : > { %4397 = vmatprep.subr.bf16.mxu1 %v4396_v32  ;;  %4407 = vmatpush3.bf16.msra.mxu0 %v4404_v28 }
  0xcc   : > { %4174 = vmatmul.mubr.msk.f32.gmra.mrb[2].mxu1 %vm940_vm1, %v928_v33 }
  0xcd   : > { %4399 = vmatpush3.bf16.msra.mxu1 %v4396_v32  ;;  %4184 = vmatprep.mubr.msk.f32.mxu1 %vm940_vm1, %v925_v12 }
  0xce   : > { %4199 = vmatmul.mubr.msk.f32.vlgmr.msra.gmra.mrb[0].mxu0 %vm940_vm1, %v918_v14 }
  0xcf   : > { %4201 = vmatprep.mubr.msk.f32.mxu0 %vm940_vm1, %v919_v17 }
  0xd0   : > { %4185 = vmatmul.mubr.msk.f32.vlgmr.msra.gmra.mrb[4].mxu1 %vm940_vm1, %v926_v27 }
  0xd1   : > { %4187 = vmatprep.mubr.msk.f32.mxu1 %vm940_vm1, %v927_v29 }
  0xd2   : > { %4202 = vmatmul.mubr.msk.f32.gmra.mrb[2].mxu0 %vm940_vm1, %v920_v30 }
  0xd4   : > { %4188 = vmatmul.mubr.msk.f32.gmra.mrb[6].mxu1 %vm940_vm1, %v928_v33 }
 0x19b   : > { %v4172_v35 = vpop.f32.mrb[0].mxu1 }
 0x19c   : > { %v1019_v36 = vpop.f32.mrb[1].mxu1  ;;  %v5426_v57 = vadd.f32 %v4172_v35, %v3929_v34 }
 0x19d   : > { %v5395_v37 = vadd.f32 %v3929_v34, %v1019_v36 }
 0x19f   : > { %v4175_v38 = vpop.f32.mrb[2].mxu1  ;;  %4208 = vmatprep.mubr.msk.f32.mxu1 %vm1246_vm2, %v5395_v37 }
 0x1a0   : > { %v1029_v39 = vpop.f32.mrb[3].mxu1  ;;  %v5430_v58 = vadd.f32 %v4175_v38, %v3929_v34 }
 0x1a1   : > { %v5399_v40 = vadd.f32 %v3929_v34, %v1029_v39  ;;  %v4200_v42 = vpop.f32.mrb[0].mxu0 }
 0x1a2   : > { %v1223_v43 = vpop.f32.mrb[1].mxu0  ;;  %v1229_v60 = vadd.f32 %v4200_v42, %v3939_v59 }
 0x1a3   : > { %v4186_v44 = vpop.f32.mrb[4].mxu1  ;;  %4215 = vmatprep.mubr.msk.f32.mxu0 %vm1246_vm2, %v5399_v40  ;;  %v1224_v61 = vadd.f32 %v3939_v59, %v1223_v43 }
 0x1a4   : > { %v1121_v45 = vadd.f32 %v4186_v44, %v3934_v41  ;;  %v1115_v46 = vpop.f32.mrb[5].mxu1 }
 0x1a5   : > { %v1116_v47 = vadd.f32 %v3934_v41, %v1115_v46  ;;  %v4203_v62 = vpop.f32.mrb[2].mxu0  ;;  %v4420_v0 = vpack.c.bf16 %v1229_v60, %v1224_v61  ;;  %v5439_v3 = vpack.i.bf16 %v1229_v60, %v1224_v61 }
 0x1a6   : > { %v1233_v63 = vpop.f32.mrb[3].mxu0  ;;  %v1239_v1 = vadd.f32 %v4203_v62, %v3939_v59 }
 0x1a7   : > { %v4189_v49 = vpop.f32.mrb[6].mxu1  ;;  %v4408_v50 = vpack.c.bf16 %v1121_v45, %v1116_v47  ;;  %v5414_v51 = vpack.i.bf16 %v1121_v45, %v1116_v47  ;;  %v1234_v2 = vadd.f32 %v3939_v59, %v1233_v63 }
 0x1a8   : > { %v1131_v52 = vadd.f32 %v4189_v49, %v3934_v41  ;;  %v1125_v53 = vpop.f32.mrb[7].mxu1 }
 0x1a9   : > { %v1126_v54 = vadd.f32 %v3934_v41, %v1125_v53  ;;  %4410 = vmatprep.subr.msk.bf16.mxu1 %vm5410_vm3, %v4408_v50  ;;  %v5441_v4 = vpack.c.bf16 %v1239_v1, %v1234_v2  ;;  %v5444_v5 = vpack.i.bf16 %v1239_v1, %v1234_v2 }
 0x1aa   : > { %4413 = vmatpush3.bf16.xpose.msk.msra.mxu1 %vm5410_vm3, %v4408_v50 }
 0x1ab   : > { %v4414_v55 = vpack.c.bf16 %v1131_v52, %v1126_v54  ;;  %v5420_v56 = vpack.i.bf16 %v1131_v52, %v1126_v54  ;;  %4421 = vmatprep.subr.bf16.mxu1 %v4420_v0 }
 0x1ad   : > { %4416 = vmatprep.subr.msk.bf16.mxu0 %vm5410_vm3, %v4414_v55 }
 0x1ae   : > { %4419 = vmatpush3.bf16.xpose.msk.msra.mxu0 %vm5410_vm3, %v4414_v55 }
 0x1b1   : > { %4209 = vmatmul.mubr.msk.f32.vlgmr.msra.gmra.mrb[8].mxu1 %vm1246_vm2, %v5426_v57 }
 0x1b2   : > { %4423 = vmatpush3.bf16.msra.mxu1 %v4420_v0 }
 0x1b3   : > { %4425 = vmatprep.subr.bf16.mxu1 %v5441_v4 }
 0x1b5   : > { %4216 = vmatmul.mubr.msk.f32.vlgmr.msra.gmra.mrb[4].mxu0 %vm1246_vm2, %v5430_v58 }
 0x284   : > { %v4210_v6 = vpop.f32.mrb[8].mxu1 }
 0x285   : > { %v1325_v7 = vpop.f32.mrb[9].mxu1  ;;  %v1422_v9 = vmul.f32 0.35355338, %v4210_v6 }
 0x286   : > { %v1421_v8 = vmul.f32 0.35355338, %v1325_v7 }
 0x287   : > { %v1429_v16 = vsel %vm1425_vm4, %v1422_v9, -inf }
 0x288   : > { %v4217_v10 = vpop.f32.mrb[4].mxu0  ;;  %v1426_v11 = vsel %vm1425_vm4, %v1421_v8, -inf }
 0x289   : > { %v1412_v12 = vpop.f32.mrb[5].mxu0  ;;  %1427 = vmax.xlane.f32.xlu0 %v1426_v11  ;;  %v1424_v14 = vmul.f32 0.35355338, %v4217_v10 }
 0x28a   : > { %v1423_v13 = vmul.f32 0.35355338, %v1412_v12 }
 0x28b   : > { %v1435_v17 = vsel %vm1425_vm4, %v1424_v14, -inf }
 0x28c   : > { %v1432_v15 = vsel %vm1425_vm4, %v1423_v13, -inf }
 0x28d   : > { %1433 = vmax.xlane.f32.xlu1 %v1432_v15  ;;  %1430 = vmax.xlane.f32.xlu0 %v1429_v16 }
 0x291   : > { %1436 = vmax.xlane.f32.xlu1 %v1435_v17 }
 0x316   : > { %v1428_v18 = vpop.xlane.xlu0 %1427 }
 0x317   : > { %v1438_v19 = vsub.f32 %v1421_v8, %v1428_v18 }
 0x319   : > { %v1442_v20 = vmul.f32 1.442695, %v1438_v19 }
 0x31a   : > { %v1434_v21 = vpop.xlane.xlu1 %1433  ;;  %v1431_v22 = vpop.xlane.xlu0 %1430 }
 0x31b   : > { %4679 = vpow2.f32 %v1442_v20  ;;  %v1440_v23 = vsub.f32 %v1423_v13, %v1434_v21  ;;  %v1439_v24 = vsub.f32 %v1422_v9, %v1431_v22 }
 0x31d   : > { %v1446_v25 = vmul.f32 1.442695, %v1440_v23  ;;  %v1444_v26 = vmul.f32 1.442695, %v1439_v24 }
 0x31e   : > { %v1437_v27 = vpop.xlane.xlu1 %1436 }
 0x31f   : > { %4681 = vpow2.f32 %v1446_v25  ;;  %v1441_v28 = vsub.f32 %v1424_v14, %v1437_v27 }
 0x320   : > { %4683 = vpow2.f32 %v1444_v26 }
 0x321   : > { %v1448_v29 = vmul.f32 1.442695, %v1441_v28 }
 0x323   : > { %4685 = vpow2.f32 %v1448_v29 }
 0x325   : > { %v4680_v30 = vpop.eup %4679 }
 0x326   : > { %v1450_v31 = vsel %vm1425_vm4, %v4680_v30, 0.0 }
 0x327   : > { %1451 = vadd.xlane.f32.xlu0 %v1450_v31 }
 0x329   : > { %v4682_v32 = vpop.eup %4681 }
 0x32a   : > { %v4684_v33 = vpop.eup %4683  ;;  %v1456_v34 = vsel %vm1425_vm4, %v4682_v32, 0.0 }
 0x32b   : > { %1457 = vadd.xlane.f32.xlu0 %v1456_v34  ;;  %v1453_v35 = vsel %vm1425_vm4, %v4684_v33, 0.0 }
 0x32c   : > { %1454 = vadd.xlane.f32.xlu1 %v1453_v35 }
 0x32d   : > { %v4686_v36 = vpop.eup %4685 }
 0x32e   : > { %v1459_v38 = vsel %vm1425_vm4, %v4686_v36, 0.0 }
 0x330   : > { %1460 = vadd.xlane.f32.xlu1 %v1459_v38 }
 0x341   : > { %1723 = vrot.lane.b32.xlu1 %v5399_v40, %s4975_s19  ;;  %4620 = vrot.lane.b32.xlu0 %v5420_v56, %s4975_s19 }
 0x345   : > { %1725 = vrot.lane.b32.xlu1 %v5430_v58, %s4975_s19  ;;  %1632 = vrot.lane.b32.xlu0 %v5395_v37, %s4975_s19 }
 0x349   : > { %4625 = vrot.lane.b32.xlu1 %v5414_v51, %s4975_s19 }
 0x34d   : > { %1634 = vrot.lane.b32.xlu1 %v5426_v57, %s4975_s19 }
 0x3b4   : > { %v1452_v39 = vpop.xlane.xlu0 %1451 }
 0x3b5   : > { %4687 = vrcp.f32 %v1452_v39 }
 0x3b8   : > { %v1458_v41 = vpop.xlane.xlu0 %1457 }
 0x3b9   : > { %v1455_v42 = vpop.xlane.xlu1 %1454  ;;  %4689 = vrcp.f32 %v1458_v41 }
 0x3ba   : > { %4691 = vrcp.f32 %v1455_v42 }
 0x3bc   : > { %v4621_v43 = vpop.permute.xlu0 %4620 }
 0x3bd   : > { %v1461_v44 = vpop.xlane.xlu1 %1460  ;;  %v4623_v52 = vunpack.i.h.bf16 %v4621_v43  ;;  %v4622_v53 = vunpack.i.l.bf16 %v4621_v43 }
 0x3be   : > { %4693 = vrcp.f32 %v1461_v44 }
 0x3bf   : > { %v4688_v45 = vpop.eup %4687  ;;  %v4434_v61 = vpack.c.bf16 %v4623_v52, %v4622_v53 }
 0x3c0   : > { %v1633_v46 = vpop.permute.xlu0 %1632  ;;  %v1466_v47 = vmul.f32 %v4688_v45, %v4680_v30 }
 0x3c1   : > { %v1724_v49 = vpop.permute.xlu1 %1723  ;;  %4236 = vmatprep.mubr.msk.f32.mxu0 %vm1246_vm2, %v1633_v46 }
 0x3c2   : > { %4222 = vmatprep.mubr.msk.f32.mxu1 %vm1425_vm4, %v1466_v47 }
 0x3c3   : > { %v4690_v50 = vpop.eup %4689 }
 0x3c4   : > { %v4692_v54 = vpop.eup %4691  ;;  %v1468_v55 = vmul.f32 %v4690_v50, %v4682_v32 }
 0x3c5   : > { %v1467_v59 = vmul.f32 %v4692_v54, %v4684_v33  ;;  %v1726_v60 = vpop.permute.xlu1 %1725 }
 0x3c7   : > { %4223 = vmatmul.mubr.msk.f32.vlgmr.msra.gmra.mrb[10].mxu1 %vm1425_vm4, %v1467_v59 }
 0x3c8   : > { %v4694_v62 = vpop.eup %4693  ;;  %4427 = vmatpush3.bf16.msra.mxu1 %v5441_v4  ;;  %4229 = vmatprep.mubr.msk.f32.mxu1 %vm1425_vm4, %v1468_v55 }
 0x3c9   : > { %v1469_v63 = vmul.f32 %v4694_v62, %v4686_v36  ;;  %4436 = vmatprep.subr.msk.bf16.mxu1 %vm5410_vm3, %v4434_v61  ;;  %v4626_v0 = vpop.permute.xlu1 %4625 }
 0x3ca   : > { %v4628_v1 = vunpack.i.h.bf16 %v4626_v0  ;;  %v4627_v2 = vunpack.i.l.bf16 %v4626_v0 }
 0x3cb   : > { %4230 = vmatmul.mubr.msk.f32.vlgmr.msra.gmra.mrb[12].mxu1 %vm1425_vm4, %v1469_v63 }
 0x3cc   : > { %v4428_v6 = vpack.c.bf16 %v4628_v1, %v4627_v2  ;;  %4243 = vmatprep.mubr.msk.f32.mxu1 %vm1246_vm2, %v1724_v49 }
 0x3cd   : > { %v1635_v4 = vpop.permute.xlu1 %1634 }
 0x3ce   : > { %4430 = vmatprep.subr.msk.bf16.mxu0 %vm5410_vm3, %v4428_v6 }
 0x3cf   : > { %4433 = vmatpush3.bf16.xpose.msk.msra.mxu0 %vm5410_vm3, %v4428_v6 }
 0x3d1   : > { %4439 = vmatpush3.bf16.xpose.msk.msra.mxu1 %vm5410_vm3, %v4434_v61 }
 0x3d6   : > { %4237 = vmatmul.mubr.msk.f32.vlgmr.msra.gmra.mrb[6].mxu0 %vm1246_vm2, %v1635_v4 }
 0x3d8   : > { %4244 = vmatmul.mubr.msk.f32.vlgmr.msra.gmra.mrb[14].mxu1 %vm1246_vm2, %v1726_v60 }
 0x49a   : > { %v5483_v7 = vpop.f32.mrb[10].mxu1 }
 0x49b   : > { %v5485_v8 = vpop.f32.mrb[11].mxu1 }
 0x49e   : > { %v5487_v9 = vpop.f32.mrb[12].mxu1 }
 0x49f   : > { %v5489_v10 = vpop.f32.mrb[13].mxu1 }
 0x4a9   : > { %v4238_v11 = vpop.f32.mrb[6].mxu0 }
 0x4aa   : > { %v1714_v12 = vpop.f32.mrb[7].mxu0  ;;  %v1815_v44 = vmul.f32 0.35355338, %v4238_v11 }
 0x4ab   : > { %v4245_v13 = vpop.f32.mrb[14].mxu1  ;;  %v1814_v19 = vmul.f32 0.35355338, %v1714_v12 }
 0x4ac   : > { %v1817_v14 = vmul.f32 0.35355338, %v4245_v13  ;;  %v1805_v15 = vpop.f32.mrb[15].mxu1  ;;  %v1821_v45 = vsel %vm1425_vm4, %v1815_v44, -inf }
 0x4ad   : > { %v1816_v16 = vmul.f32 0.35355338, %v1805_v15  ;;  %v1818_v20 = vsel %vm1425_vm4, %v1814_v19, -inf }
 0x4ae   : > { %v1827_v17 = vsel %vm1425_vm4, %v1817_v14, -inf }
 0x4af   : > { %1828 = vmax.xlane.f32.xlu1 %v1827_v17  ;;  %v1824_v18 = vsel %vm1425_vm4, %v1816_v16, -inf }
 0x4b0   : > { %1825 = vmax.xlane.f32.xlu0 %v1824_v18 }
 0x4c0   : > { %4635 = vrot.lane.b32.xlu1 %v5414_v51, %s4976_s21 }
 0x4c4   : > { %4640 = vrot.lane.b32.xlu1 %v5420_v56, %s4976_s21 }
 0x4c8   : > { %2234 = vrot.lane.b32.xlu1 %v5395_v37, %s4976_s21 }
 0x4cc   : > { %2325 = vrot.lane.b32.xlu1 %v5399_v40, %s4976_s21 }
 0x4f0   : > { %1819 = vmax.xlane.f32.xlu1 %v1818_v20 }
 0x501   : > { %4645 = vrot.lane.b32.xlu1 %v5439_v3, %s4975_s19 }
 0x53c   : > { %v1829_v21 = vpop.xlane.xlu1 %1828 }
 0x53d   : > { %v1833_v22 = vsub.f32 %v1817_v14, %v1829_v21  ;;  %v1826_v23 = vpop.xlane.xlu0 %1825 }
 0x53e   : > { %v1832_v24 = vsub.f32 %v1816_v16, %v1826_v23 }
 0x53f   : > { %v1840_v25 = vmul.f32 1.442695, %v1833_v22 }
 0x540   : > { %v1838_v26 = vmul.f32 1.442695, %v1832_v24  ;;  %v4636_v31 = vpop.permute.xlu1 %4635 }
 0x541   : > { %4695 = vpow2.f32 %v1840_v25  ;;  %v4638_v53 = vunpack.i.h.bf16 %v4636_v31  ;;  %v4637_v54 = vunpack.i.l.bf16 %v4636_v31 }
 0x542   : > { %4697 = vpow2.f32 %v1838_v26 }
 0x543   : > { %v4448_v61 = vpack.c.bf16 %v4638_v53, %v4637_v54 }
 0x544   : > { %v4641_v32 = vpop.permute.xlu1 %4640 }
 0x545   : > { %v4643_v2 = vunpack.i.h.bf16 %v4641_v32  ;;  %v4642_v6 = vunpack.i.l.bf16 %v4641_v32 }
 0x547   : > { %v4454_v4 = vpack.c.bf16 %v4643_v2, %v4642_v6 }
 0x548   : > { %v2235_v33 = vpop.permute.xlu1 %2234 }
 0x54b   : > { %v4696_v27 = vpop.eup %4695 }
 0x54c   : > { %v1851_v28 = vsel %vm1425_vm4, %v4696_v27, 0.0  ;;  %v4698_v29 = vpop.eup %4697  ;;  %v2326_v34 = vpop.permute.xlu1 %2325 }
 0x54d   : > { %1852 = vadd.xlane.f32.xlu0 %v1851_v28  ;;  %v1848_v30 = vsel %vm1425_vm4, %v4698_v29, 0.0 }
 0x551   : > { %1849 = vadd.xlane.f32.xlu0 %v1848_v30 }
 0x567   : > { %4630 = vrot.lane.b32.xlu0 %v5444_v5, %s4975_s19 }
 0x56b   : > { %2236 = vrot.lane.b32.xlu0 %v5426_v57, %s4976_s21 }
 0x56f   : > { %2327 = vrot.lane.b32.xlu0 %v5430_v58, %s4976_s21 }
 0x57d   : > { %v1820_v35 = vpop.xlane.xlu1 %1819 }
 0x57e   : > { %v1830_v36 = vsub.f32 %v1814_v19, %v1820_v35 }
 0x580   : > { %v1834_v38 = vmul.f32 1.442695, %v1830_v36 }
 0x581   : > { %v4646_v39 = vpop.permute.xlu1 %4645 }
 0x582   : > { %v4648_v41 = vunpack.i.h.bf16 %v4646_v39  ;;  %v4647_v42 = vunpack.i.l.bf16 %v4646_v39  ;;  %4699 = vpow2.f32 %v1834_v38  ;;  %v1243_v39 = vld [vmem:[%s5291_s2 + $0x8] sm:$0xff] }
 0x584   : > { %v4440_v43 = vpack.c.bf16 %v4648_v41, %v4647_v42  ;;  %v1242_v41 = vld [vmem:[%s5291_s2] sm:$0xff] }
 0x586   : > { %4441 = vmatprep.subr.bf16.mxu0 %v4440_v43 }
 0x587   : > { %4443 = vmatpush3.bf16.msra.mxu0 %v4440_v43 }
 0x588   : > { %4260 = vmatprep.subr.mxu0 %v1243_v39 }
 0x58c   : > { %v4700_v46 = vpop.eup %4699 }
 0x58d   : > { %v1842_v47 = vsel %vm1425_vm4, %v4700_v46, 0.0 }
 0x58e   : > { %1822 = vmax.xlane.f32.xlu0 %v1821_v45 }
 0x592   : > { %1843 = vadd.xlane.f32.xlu0 %v1842_v47 }
 0x5da   : > { %v1853_v49 = vpop.xlane.xlu0 %1852 }
 0x5db   : > { %4701 = vrcp.f32 %v1853_v49 }
 0x5de   : > { %v1850_v50 = vpop.xlane.xlu0 %1849 }
 0x5df   : > { %4703 = vrcp.f32 %v1850_v50 }
 0x5e2   : > { %v4631_v52 = vpop.permute.xlu0 %4630 }
 0x5e3   : > { %v4633_v55 = vunpack.i.h.bf16 %v4631_v52  ;;  %v4632_v59 = vunpack.i.l.bf16 %v4631_v52 }
 0x5e5   : > { %v4444_v60 = vpack.c.bf16 %v4633_v55, %v4632_v59  ;;  %v4702_v62 = vpop.eup %4701 }
 0x5e6   : > { %v1861_v1 = vmul.f32 %v4702_v62, %v4696_v27  ;;  %v2237_v11 = vpop.permute.xlu0 %2236 }
 0x5e7   : > { %4445 = vmatprep.subr.bf16.mxu1 %v4444_v60 }
 0x5e8   : > { %4447 = vmatpush3.bf16.msra.mxu1 %v4444_v60 }
 0x5e9   : > { %v4704_v63 = vpop.eup %4703  ;;  %4450 = vmatprep.subr.msk.bf16.mxu1 %vm5410_vm3, %v4448_v61 }
 0x5ea   : > { %v1860_v0 = vmul.f32 %v4704_v63, %v4698_v29  ;;  %v2328_v12 = vpop.permute.xlu0 %2327 }
 0x5ec   : > { %4257 = vmatprep.mubr.msk.f32.mxu1 %vm1425_vm4, %v1860_v0 }
 0x5ed   : > { %4258 = vmatmul.mubr.msk.f32.vlgmr.msra.gmra.mrb[16].mxu1 %vm1425_vm4, %v1861_v1 }
 0x5ee   : > { %4280 = vmatprep.mubr.msk.f32.mxu1 %vm1246_vm2, %v2235_v33 }
 0x5f1   : > { %4453 = vmatpush3.bf16.xpose.msk.msra.mxu1 %vm5410_vm3, %v4448_v61 }
 0x5f2   : > { %4456 = vmatprep.subr.msk.bf16.mxu1 %vm5410_vm3, %v4454_v4 }
 0x5f8   : > { %4281 = vmatmul.mubr.msk.f32.vlgmr.msra.gmra.mrb[18].mxu1 %vm1246_vm2, %v2237_v11 }
 0x5f9   : > { %4459 = vmatpush3.bf16.xpose.msk.msra.mxu1 %vm5410_vm3, %v4454_v4  ;;  %4287 = vmatprep.mubr.msk.f32.mxu1 %vm1246_vm2, %v2326_v34 }
 0x600   : > { %4288 = vmatmul.mubr.msk.f32.vlgmr.msra.gmra.mrb[20].mxu1 %vm1246_vm2, %v2328_v12 }
 0x61b   : > { %v1823_v13 = vpop.xlane.xlu0 %1822 }
 0x61c   : > { %v1831_v14 = vsub.f32 %v1815_v44, %v1823_v13 }
 0x61e   : > { %v1836_v15 = vmul.f32 1.442695, %v1831_v14 }
 0x61f   : > { %v1844_v16 = vpop.xlane.xlu0 %1843 }
 0x620   : > { %4705 = vpow2.f32 %v1836_v15 }
 0x621   : > { %4707 = vrcp.f32 %v1844_v16 }
 0x62a   : > { %v4706_v17 = vpop.eup %4705 }
 0x62b   : > { %v4708_v18 = vpop.eup %4707  ;;  %v1845_v19 = vsel %vm1425_vm4, %v4706_v17, 0.0 }
 0x62c   : > { %1846 = vadd.xlane.f32.xlu0 %v1845_v19  ;;  %v1858_v20 = vmul.f32 %v4708_v18, %v4700_v46 }
 0x62e   : > { %4250 = vmatprep.mubr.msk.f32.mxu0 %vm1425_vm4, %v1858_v20 }
 0x6b9   : > { %v1847_v21 = vpop.xlane.xlu0 %1846 }
 0x6ba   : > { %4709 = vrcp.f32 %v1847_v21 }
 0x6c0   : > { %v5530_v22 = vpop.f32.mrb[16].mxu1 }
 0x6c1   : > { %v5532_v23 = vpop.f32.mrb[17].mxu1 }
 0x6c4   : > { %v4710_v24 = vpop.eup %4709 }
 0x6c5   : > { %v1859_v25 = vmul.f32 %v4710_v24, %v4706_v17  ;;  %v1244_v17 = vld [vmem:[%s5291_s2 + $0x10] sm:$0xff] }
 0x6c7   : > { %4251 = vmatmul.mubr.msk.f32.vlgmr.msra.gmra.mrb[8].mxu0 %vm1425_vm4, %v1859_v25 }
 0x6c8   : > { %4261 = vmatpush3.msra.mxu0 %v1243_v39 }
 0x6c9   : > { %4268 = vmatprep.subr.mxu0 %v1242_v41 }
 0x6cb   : > { %v4282_v26 = vpop.f32.mrb[18].mxu1 }
 0x6cc   : > { %v2417_v27 = vmul.f32 0.35355338, %v4282_v26  ;;  %v2316_v28 = vpop.f32.mrb[19].mxu1 }
 0x6cd   : > { %v2416_v29 = vmul.f32 0.35355338, %v2316_v28 }
 0x6ce   : > { %v2423_v30 = vsel %vm1425_vm4, %v2417_v27, -inf }
 0x6cf   : > { %2424 = vmax.xlane.f32.xlu0 %v2423_v30  ;;  %v2420_v31 = vsel %vm1425_vm4, %v2416_v29, -inf }
 0x6d3   : > { %2421 = vmax.xlane.f32.xlu0 %v2420_v31  ;;  %v4289_v32 = vpop.f32.mrb[20].mxu1 }
 0x6d4   : > { %v2407_v33 = vpop.f32.mrb[21].mxu1  ;;  %v2419_v35 = vmul.f32 0.35355338, %v4289_v32 }
 0x6d5   : > { %v2418_v34 = vmul.f32 0.35355338, %v2407_v33 }
 0x6d6   : > { %v2429_v38 = vsel %vm1425_vm4, %v2419_v35, -inf }
 0x6d7   : > { %v2426_v36 = vsel %vm1425_vm4, %v2418_v34, -inf }
 0x6d8   : > { %2427 = vmax.xlane.f32.xlu0 %v2426_v36 }
 0x6dc   : > { %2430 = vmax.xlane.f32.xlu0 %v2429_v38 }
 0x75c   : > { %v2425_v42 = vpop.xlane.xlu0 %2424 }
 0x75d   : > { %v2433_v43 = vsub.f32 %v2417_v27, %v2425_v42 }
 0x75f   : > { %v2438_v44 = vmul.f32 1.442695, %v2433_v43 }
 0x760   : > { %v2422_v45 = vpop.xlane.xlu0 %2421 }
 0x761   : > { %4711 = vpow2.f32 %v2438_v44  ;;  %v2432_v46 = vsub.f32 %v2416_v29, %v2422_v45 }
 0x763   : > { %v2436_v47 = vmul.f32 1.442695, %v2432_v46 }
 0x765   : > { %4713 = vpow2.f32 %v2436_v47  ;;  %v2428_v49 = vpop.xlane.xlu0 %2427 }
 0x766   : > { %v2434_v50 = vsub.f32 %v2418_v34, %v2428_v49 }
 0x768   : > { %v2440_v55 = vmul.f32 1.442695, %v2434_v50 }
 0x769   : > { %v2431_v52 = vpop.xlane.xlu0 %2430 }
 0x76a   : > { %v2435_v53 = vsub.f32 %v2419_v35, %v2431_v52 }
 0x76b   : > { %v5541_v54 = vpop.eup %4711 }
 0x76c   : > { %v2442_v59 = vmul.f32 1.442695, %v2435_v53  ;;  %v2447_v60 = vsel %vm1425_vm4, %v5541_v54, 0.0 }
 0x76d   : > { %2448 = vadd.xlane.f32.xlu0 %v2447_v60 }
 0x76e   : > { %4715 = vpow2.f32 %v2442_v59 }
 0x76f   : > { %v4714_v61 = vpop.eup %4713  ;;  %4717 = vpow2.f32 %v2440_v55 }
 0x770   : > { %v2444_v62 = vsel %vm1425_vm4, %v4714_v61, 0.0 }
 0x771   : > { %2445 = vadd.xlane.f32.xlu1 %v2444_v62 }
 0x778   : > { %v4716_v63 = vpop.eup %4715 }
 0x779   : > { %v2453_v0 = vsel %vm1425_vm4, %v4716_v63, 0.0  ;;  %v4718_v1 = vpop.eup %4717 }
 0x77a   : > { %2454 = vadd.xlane.f32.xlu0 %v2453_v0  ;;  %v2450_v2 = vsel %vm1425_vm4, %v4718_v1, 0.0 }
 0x77e   : > { %2451 = vadd.xlane.f32.xlu0 %v2450_v2 }
 0x782   : > { %4655 = vrot.lane.b32.xlu1 %v5444_v5, %s4976_s21 }
 0x786   : > { %2832 = vrot.lane.b32.xlu1 %v5430_v58, %s4977_s26 }
 0x794   : > { %4650 = vrot.lane.b32.xlu0 %v5439_v3, %s4976_s21 }
 0x798   : > { %4660 = vrot.lane.b32.xlu0 %v5414_v51, %s4977_s26 }
 0x79a   : > { %v4252_v6 = vpop.f32.mrb[8].mxu0 }
 0x79b   : > { %v1942_v4 = vpop.f32.mrb[9].mxu0 }
 0x79c   : > { %4262 = vmatprep.mubr.msk.f32.mxu0 %vm1246_vm2, %v1942_v4  ;;  %4665 = vrot.lane.b32.xlu0 %v5420_v56, %s4977_s26 }
 0x79d   : > { %4263 = vmatmul.mubr.msk.f32.vlgmr.msra.gmra.mrb[10].mxu0 %vm1246_vm2, %v4252_v6 }
 0x79e   : > { %4265 = vmatprep.mubr.msk.f32.mxu0 %vm1246_vm2, %v5532_v23  ;;  %4269 = vmatpush3.msra.mxu0 %v1242_v41 }
 0x7a0   : > { %2739 = vrot.lane.b32.xlu0 %v5395_v37, %s4977_s26 }
 0x7a1   : > { %4266 = vmatmul.mubr.msk.f32.gmra.mrb[12].mxu0 %vm1246_vm2, %v5530_v22 }
 0x7a2   : > { %4270 = vmatprep.mubr.msk.f32.mxu0 %vm1246_vm2, %v5485_v8 }
 0x7a4   : > { %2741 = vrot.lane.b32.xlu0 %v5426_v57, %s4977_s26 }
 0x7a5   : > { %4271 = vmatmul.mubr.msk.f32.vlgmr.msra.gmra.mrb[10].mxu0 %vm1246_vm2, %v5483_v7 }
 0x7a6   : > { %4273 = vmatprep.mubr.msk.f32.mxu0 %vm1246_vm2, %v5489_v10 }
 0x7a8   : > { %2830 = vrot.lane.b32.xlu0 %v5399_v40, %s4977_s26 }
 0x7a9   : > { %4274 = vmatmul.mubr.msk.f32.gmra.mrb[12].mxu0 %vm1246_vm2, %v5487_v9 }
 0x7fa   : > { %v2449_v56 = vpop.xlane.xlu0 %2448 }
 0x7fe   : > { %v2446_v37 = vpop.xlane.xlu1 %2445 }
 0x7ff   : > { %4719 = vrcp.f32 %v2446_v37 }
 0x800   : > { %4721 = vrcp.f32 %v2449_v56 }
 0x802   : > { %v4656_v51 = vpop.permute.xlu1 %4655 }
 0x803   : > { %v4658_v58 = vunpack.i.h.bf16 %v4656_v51  ;;  %v4657_v8 = vunpack.i.l.bf16 %v4656_v51 }
 0x805   : > { %v4464_v11 = vpack.c.bf16 %v4658_v58, %v4657_v8 }
 0x806   : > { %v2833_v38 = vpop.permute.xlu1 %2832 }
 0x807   : > { %4465 = vmatprep.subr.bf16.mxu1 %v4464_v11  ;;  %v2455_v57 = vpop.xlane.xlu0 %2454 }
 0x808   : > { %4467 = vmatpush3.bf16.msra.mxu1 %v4464_v11  ;;  %4723 = vrcp.f32 %v2455_v57 }
 0x809   : > { %v4720_v7 = vpop.eup %4719 }
 0x80a   : > { %v2460_v10 = vmul.f32 %v4720_v7, %v4714_v61  ;;  %v4722_v15 = vpop.eup %4721 }
 0x80b   : > { %v2452_v12 = vpop.xlane.xlu0 %2451  ;;  %v2461_v22 = vmul.f32 %v4722_v15, %v5541_v54 }
 0x80c   : > { %4725 = vrcp.f32 %v2452_v12  ;;  %4294 = vmatprep.mubr.msk.f32.mxu0 %vm1425_vm4, %v2460_v10 }
 0x80f   : > { %v4651_v40 = vpop.permute.xlu0 %4650 }
 0x810   : > { %v4653_v9 = vunpack.i.h.bf16 %v4651_v40  ;;  %v4652_v13 = vunpack.i.l.bf16 %v4651_v40 }
 0x812   : > { %v4460_v14 = vpack.c.bf16 %v4653_v9, %v4652_v13  ;;  %v4724_v20 = vpop.eup %4723 }
 0x813   : > { %v4661_v16 = vpop.permute.xlu0 %4660  ;;  %v2463_v26 = vmul.f32 %v4724_v20, %v4716_v63 }
 0x814   : > { %v4663_v18 = vunpack.i.h.bf16 %v4661_v16  ;;  %v4662_v19 = vunpack.i.l.bf16 %v4661_v16  ;;  %4461 = vmatprep.subr.bf16.mxu0 %v4460_v14 }
 0x815   : > { %4463 = vmatpush3.bf16.msra.mxu0 %v4460_v14 }
 0x816   : > { %v4726_v21 = vpop.eup %4725  ;;  %v4468_v23 = vpack.c.bf16 %v4663_v18, %v4662_v19  ;;  %4304 = vmatprep.subr.mxu0 %v1244_v17 }
 0x817   : > { %v4666_v24 = vpop.permute.xlu0 %4665  ;;  %v2462_v25 = vmul.f32 %v4726_v21, %v4718_v1 }
 0x818   : > { %v4668_v27 = vunpack.i.h.bf16 %v4666_v24  ;;  %v4667_v28 = vunpack.i.l.bf16 %v4666_v24  ;;  %4295 = vmatmul.mubr.msk.f32.vlgmr.msra.gmra.mrb[14].mxu0 %vm1425_vm4, %v2461_v22  ;;  %4470 = vmatprep.subr.msk.bf16.mxu1 %vm5410_vm3, %v4468_v23 }
 0x819   : > { %4301 = vmatprep.mubr.msk.f32.mxu1 %vm1425_vm4, %v2462_v25  ;;  %4305 = vmatpush3.msra.mxu0 %v1244_v17 }
 0x81a   : > { %v4474_v29 = vpack.c.bf16 %v4668_v27, %v4667_v28  ;;  %4302 = vmatmul.mubr.msk.f32.vlgmr.msra.gmra.mrb[22].mxu1 %vm1425_vm4, %v2463_v26  ;;  %v1245_v26 = vld [vmem:[%s5291_s2 + $0x18] sm:$0xff] }
 0x81b   : > { %4473 = vmatpush3.bf16.xpose.msk.msra.mxu1 %vm5410_vm3, %v4468_v23  ;;  %v2740_v30 = vpop.permute.xlu0 %2739 }
 0x81c   : > { %4316 = vmatprep.mubr.msk.f32.mxu1 %vm1246_vm2, %v2740_v30  ;;  %4476 = vmatprep.subr.msk.bf16.mxu0 %vm5410_vm3, %v4474_v29 }
 0x81f   : > { %v2742_v31 = vpop.permute.xlu0 %2741 }
 0x822   : > { %4317 = vmatmul.mubr.msk.f32.vlgmr.msra.gmra.mrb[24].mxu1 %vm1246_vm2, %v2742_v31  ;;  %v4008_v31 = vld [vmem:[%s5862_s3] ss:$0 sm:$0xff] }
 0x823   : > { %v2831_v36 = vpop.permute.xlu0 %2830 }
 0x8eb   : > { %v4296_v32 = vpop.f32.mrb[14].mxu0 }
 0x8ec   : > { %v2542_v33 = vpop.f32.mrb[15].mxu0 }
 0x8ed   : > { %v4303_v34 = vpop.f32.mrb[22].mxu1  ;;  %4306 = vmatprep.mubr.msk.f32.mxu0 %vm1246_vm2, %v2542_v33 }
 0x8ee   : > { %v2629_v35 = vpop.f32.mrb[23].mxu1  ;;  %4307 = vmatmul.mubr.msk.f32.vlgmr.msra.gmra.mrb[10].mxu0 %vm1246_vm2, %v4296_v32 }
 0x8ef   : > { %4479 = vmatpush3.bf16.xpose.msk.msra.mxu0 %vm5410_vm3, %v4474_v29  ;;  %4309 = vmatprep.mubr.msk.f32.mxu0 %vm1246_vm2, %v2629_v35 }
 0x8f2   : > { %4310 = vmatmul.mubr.msk.f32.gmra.mrb[12].mxu0 %vm1246_vm2, %v4303_v34 }
 0x8f3   : > { %4323 = vmatprep.mubr.msk.f32.mxu0 %vm1246_vm2, %v2831_v36  ;;  %v4759_v36 = vld [vmem:[#allocation2 + $0x8] sm:$0xff] }
 0x8f5   : > { %v4318_v39 = vpop.f32.mrb[24].mxu1 }
 0x8f6   : > { %v2922_v41 = vmul.f32 0.35355338, %v4318_v39  ;;  %v2821_v42 = vpop.f32.mrb[25].mxu1  ;;  %4324 = vmatmul.mubr.msk.f32.vlgmr.msra.gmra.mrb[16].mxu0 %vm1246_vm2, %v2833_v38  ;;  %v4760_v39 = vld [vmem:[#allocation2] sm:$0xff] }
 0x8f7   : > { %v2921_v43 = vmul.f32 0.35355338, %v2821_v42 }
 0x8f8   : > { %v2928_v44 = vsel %vm1425_vm4, %v2922_v41, -inf }
 0x8f9   : > { %2929 = vmax.xlane.f32.xlu1 %v2928_v44  ;;  %v2925_v48 = vsel %vm1425_vm4, %v2921_v43, -inf }
 0x8fa   : > { %2926 = vmax.xlane.f32.xlu0 %v2925_v48 }
 0x986   : > { %v2930_v52 = vpop.xlane.xlu1 %2929 }
 0x987   : > { %v2927_v45 = vpop.xlane.xlu0 %2926  ;;  %v2938_v53 = vsub.f32 %v2922_v41, %v2930_v52 }
 0x988   : > { %v2937_v46 = vsub.f32 %v2921_v43, %v2927_v45 }
 0x989   : > { %v2943_v54 = vmul.f32 1.442695, %v2938_v53 }
 0x98a   : > { %v2941_v47 = vmul.f32 1.442695, %v2937_v46 }
 0x98c   : > { %4727 = vpow2.f32 %v2941_v47  ;;  %v4761_v47 = vld [vmem:[#allocation2 + $0x18] sm:$0xff] }
 0x98d   : > { %4729 = vpow2.f32 %v2943_v54 }
 0x996   : > { %v4728_v49 = vpop.eup %4727 }
 0x997   : > { %v2949_v50 = vsel %vm1425_vm4, %v4728_v49, 0.0  ;;  %v4730_v0 = vpop.eup %4729 }
 0x998   : > { %2950 = vadd.xlane.f32.xlu1 %v2949_v50  ;;  %v2952_v1 = vsel %vm1425_vm4, %v4730_v0, 0.0  ;;  %v4762_v50 = vld [vmem:[#allocation2 + $0x10] sm:$0xff] }
 0x9c9   : > { %v4325_v55 = vpop.f32.mrb[16].mxu0 }
 0x9ca   : > { %v2912_v59 = vpop.f32.mrb[17].mxu0  ;;  %v2924_v61 = vmul.f32 0.35355338, %v4325_v55 }
 0x9cb   : > { %v2923_v60 = vmul.f32 0.35355338, %v2912_v59 }
 0x9cc   : > { %v2934_v63 = vsel %vm1425_vm4, %v2924_v61, -inf }
 0x9cd   : > { %v2931_v62 = vsel %vm1425_vm4, %v2923_v60, -inf }
 0x9ce   : > { %2932 = vmax.xlane.f32.xlu0 %v2931_v62 }
 0x9d2   : > { %2935 = vmax.xlane.f32.xlu0 %v2934_v63 }
 0x9d6   : > { %2953 = vadd.xlane.f32.xlu0 %v2952_v1 }
 0xa25   : > { %v2951_v2 = vpop.xlane.xlu1 %2950 }
 0xa26   : > { %4731 = vrcp.f32 %v2951_v2 }
 0xa30   : > { %v4732_v6 = vpop.eup %4731 }
 0xa31   : > { %v2965_v4 = vmul.f32 %v4732_v6, %v4728_v49 }
 0xa33   : > { %4330 = vmatprep.mubr.msk.f32.mxu1 %vm1425_vm4, %v2965_v4 }
 0xa5b   : > { %v2933_v37 = vpop.xlane.xlu0 %2932 }
 0xa5c   : > { %v2939_v51 = vsub.f32 %v2923_v60, %v2933_v37 }
 0xa5e   : > { %v2945_v56 = vmul.f32 1.442695, %v2939_v51 }
 0xa5f   : > { %v2936_v58 = vpop.xlane.xlu0 %2935 }
 0xa60   : > { %4733 = vpow2.f32 %v2945_v56  ;;  %v2940_v8 = vsub.f32 %v2924_v61, %v2936_v58 }
 0xa62   : > { %v2947_v11 = vmul.f32 1.442695, %v2940_v8 }
 0xa63   : > { %v2954_v40 = vpop.xlane.xlu0 %2953 }
 0xa64   : > { %4735 = vpow2.f32 %v2947_v11 }
 0xa65   : > { %4737 = vrcp.f32 %v2954_v40  ;;  %v3335_v40 = vld [vmem:[%s5363_s4 + $0x8] sm:$0xff] }
 0xa6a   : > { %v4734_v57 = vpop.eup %4733 }
 0xa6b   : > { %v2955_v7 = vsel %vm1425_vm4, %v4734_v57, 0.0 }
 0xa6c   : > { %2956 = vadd.xlane.f32.xlu1 %v2955_v7 }
 0xa6e   : > { %v4736_v10 = vpop.eup %4735 }
 0xa6f   : > { %v2958_v12 = vsel %vm1425_vm4, %v4736_v10, 0.0  ;;  %v4738_v18 = vpop.eup %4737 }
 0xa70   : > { %2959 = vadd.xlane.f32.xlu0 %v2958_v12  ;;  %v2966_v22 = vmul.f32 %v4738_v18, %v4730_v0  ;;  %v3334_v12 = vld [vmem:[%s5363_s4] sm:$0xff]  ;;  %v3448_v18 = vld [vmem:[%s5349_s8 + $0x10] sm:$0xff] }
 0xa7d   : > { %4670 = vrot.lane.b32.xlu1 %v5439_v3, %s4977_s26 }
 0xa86   : > { %4675 = vrot.lane.b32.xlu0 %v5444_v5, %s4977_s26 }
 0xaf9   : > { %v2957_v9 = vpop.xlane.xlu1 %2956 }
 0xafa   : > { %4739 = vrcp.f32 %v2957_v9  ;;  %v4488_v9 = vpack.c.bf16 %v3335_v40, %v3334_v12 }
 0xafd   : > { %v4671_v13 = vpop.permute.xlu1 %4670  ;;  %v2960_v14 = vpop.xlane.xlu0 %2959 }
 0xafe   : > { %v4673_v15 = vunpack.i.h.bf16 %v4671_v13  ;;  %v4672_v16 = vunpack.i.l.bf16 %v4671_v13  ;;  %4741 = vrcp.f32 %v2960_v14  ;;  %v3336_v13 = vld [vmem:[%s5363_s4 + $0x10] sm:$0xff]  ;;  %v3337_v14 = vld [vmem:[%s5363_s4 + $0x18] sm:$0xff] }
 0xb00   : > { %v4480_v17 = vpack.c.bf16 %v4673_v15, %v4672_v16  ;;  %v4492_v15 = vpack.c.bf16 %v3337_v14, %v3336_v13  ;;  %v3446_v16 = vld [vmem:[%s5349_s8] sm:$0xff] }
 0xb01   : > { %v4676_v19 = vpop.permute.xlu0 %4675 }
 0xb02   : > { %v4678_v20 = vunpack.i.h.bf16 %v4676_v19  ;;  %v4677_v21 = vunpack.i.l.bf16 %v4676_v19  ;;  %4481 = vmatprep.subr.bf16.mxu1 %v4480_v17 }
 0xb03   : > { %4483 = vmatpush3.bf16.msra.mxu1 %v4480_v17  ;;  %v3447_v17 = vld [vmem:[%s5349_s8 + $0x8] sm:$0xff] }
 0xb04   : > { %v4740_v3 = vpop.eup %4739  ;;  %v4484_v5 = vpack.c.bf16 %v4678_v20, %v4677_v21  ;;  %4489 = vmatprep.subr.bf16.mxu1 %v4488_v9  ;;  %v4496_v19 = vpack.c.bf16 %v3447_v17, %v3446_v16  ;;  %v3449_v20 = vld [vmem:[%s5349_s8 + $0x18] sm:$0xff] }
 0xb05   : > { %v2967_v23 = vmul.f32 %v4740_v3, %v4734_v57  ;;  %v4500_v21 = vpack.c.bf16 %v3449_v20, %v3448_v18  ;;  %v3450_v3 = vld [vmem:[%s5349_s8 + $0x20] sm:$0xff] }
 0xb06   : > { %4331 = vmatmul.mubr.msk.f32.vlgmr.msra.gmra.mrb[26].mxu1 %vm1425_vm4, %v2966_v22  ;;  %4485 = vmatprep.subr.bf16.mxu0 %v4484_v5  ;;  %v3451_v22 = vld [vmem:[%s5349_s8 + $0x28] sm:$0xff] }
 0xb07   : > { %4487 = vmatpush3.bf16.msra.mxu0 %v4484_v5  ;;  %4337 = vmatprep.mubr.msk.f32.mxu0 %vm1425_vm4, %v2967_v23  ;;  %v4504_v5 = vpack.c.bf16 %v3451_v22, %v3450_v3 }
 0xb08   : > { %v4742_v24 = vpop.eup %4741  ;;  %4340 = vmatprep.subr.mxu0 %v1245_v26  ;;  %4491 = vmatpush3.bf16.msra.mxu1 %v4488_v9 }
 0xb09   : > { %v2968_v25 = vmul.f32 %v4742_v24, %v4736_v10  ;;  %4493 = vmatprep.subr.bf16.mxu1 %v4492_v15 }
 0xb0b   : > { %4338 = vmatmul.mubr.msk.f32.vlgmr.msra.gmra.mrb[18].mxu0 %vm1425_vm4, %v2968_v25 }
 0xb0c   : > { %4341 = vmatpush3.msra.mxu0 %v1245_v26  ;;  %4495 = vmatpush3.bf16.msra.mxu1 %v4492_v15 }
 0xb0d   : > { %4497 = vmatprep.subr.bf16.mxu0 %v4496_v19 }
 0xbd9   : > { %v4332_v27 = vpop.f32.mrb[26].mxu1 }
 0xbda   : > { %v3047_v28 = vpop.f32.mrb[27].mxu1 }
 0xbdb   : > { %4342 = vmatprep.mubr.msk.f32.mxu0 %vm1246_vm2, %v3047_v28 }
 0xbdc   : > { %4343 = vmatmul.mubr.msk.f32.vlgmr.msra.gmra.mrb[10].mxu0 %vm1246_vm2, %v4332_v27 }
 0xbdd   : > { %4499 = vmatpush3.bf16.msra.mxu0 %v4496_v19 }
 0xbde   : > { %v4339_v29 = vpop.f32.mrb[18].mxu0  ;;  %4501 = vmatprep.subr.bf16.mxu0 %v4500_v21 }
 0xbdf   : > { %v3134_v30 = vpop.f32.mrb[19].mxu0 }
 0xbe0   : > { %4345 = vmatprep.mubr.msk.f32.mxu0 %vm1246_vm2, %v3134_v30 }
 0xbe1   : > { %4346 = vmatmul.mubr.msk.f32.gmra.mrb[12].mxu0 %vm1246_vm2, %v4339_v29 }
 0xbe2   : > { %4503 = vmatpush3.bf16.msra.mxu0 %v4500_v21 }
 0xbe3   : > { %4505 = vmatprep.subr.bf16.mxu0 %v4504_v5 }
 0xbe6   : > { %4507 = vmatpush3.bf16.msra.mxu0 %v4504_v5 }
 0xcaf   : > { %v4344_v32 = vpop.f32.mrb[10].mxu0 }
 0xcb0   : > { %v3252_v33 = vadd.f32 %v4344_v32, %v4008_v31  ;;  %v3221_v34 = vpop.f32.mrb[11].mxu0 }
 0xcb1   : > { %v3251_v35 = vadd.f32 %v4008_v31, %v3221_v34 }
 0xcb2   : > { %v3256_v38 = vadd.f32 %v4759_v36, %v3252_v33  ;;  %v4009_v36 = vld [vmem:[%s5864_s27] ss:$0 sm:$0xff] }
 0xcb3   : > { %v3255_v41 = vadd.f32 %v4760_v39, %v3251_v35 }
 0xcb4   : > { %v4347_v42 = vpop.f32.mrb[12].mxu0  ;;  %v3262_v43 = vsel %vm940_vm1, %v3256_v38, 0.0 }
 0xcb5   : > { %v3254_v44 = vadd.f32 %v4347_v42, %v4008_v31  ;;  %3263 = vadd.xlane.f32.xlu0 %v3262_v43  ;;  %v3231_v48 = vpop.f32.mrb[13].mxu0  ;;  %v3259_v45 = vsel %vm940_vm1, %v3255_v41, 0.0  ;;  %v4010_v42 = vld [vmem:[%s5866_s1] ss:$0 sm:$0xff] }
 0xcb6   : > { %v3253_v46 = vadd.f32 %v4008_v31, %v3231_v48  ;;  %3260 = vadd.xlane.f32.xlu1 %v3259_v45 }
 0xcb7   : > { %v3258_v49 = vadd.f32 %v4761_v47, %v3254_v44 }
 0xcb8   : > { %v3257_v52 = vadd.f32 %v4762_v50, %v3253_v46 }
 0xcb9   : > { %v3268_v53 = vsel %vm940_vm1, %v3258_v49, 0.0 }
 0xcba   : > { %3269 = vadd.xlane.f32.xlu0 %v3268_v53  ;;  %v3265_v54 = vsel %vm940_vm1, %v3257_v52, 0.0 }
 0xcbb   : > { %3266 = vadd.xlane.f32.xlu1 %v3265_v54 }
 0xd42   : > { %v3264_v55 = vpop.xlane.xlu0 %3263 }
 0xd43   : > { %v3273_v59 = vmul.f32 0.03125, %v3264_v55  ;;  %v3261_v60 = vpop.xlane.xlu1 %3260 }
 0xd44   : > { %v3272_v61 = vmul.f32 0.03125, %v3261_v60  ;;  %v3453_v60 = vld [vmem:[%s5349_s8 + $0x38] sm:$0xff] }
 0xd45   : > { %v5630_v62 = vsub.f32 %v3256_v38, %v3273_v59  ;;  %v3452_v59 = vld [vmem:[%s5349_s8 + $0x30] sm:$0xff] }
 0xd46   : > { %v5632_v63 = vsub.f32 %v3255_v41, %v3272_v61  ;;  %v4508_v61 = vpack.c.bf16 %v3453_v60, %v3452_v59 }
 0xd47   : > { %v3270_v0 = vpop.xlane.xlu0 %3269  ;;  %v3281_v1 = vmul.f32 %v5630_v62, %v5630_v62 }
 0xd48   : > { %v3275_v2 = vmul.f32 0.03125, %v3270_v0  ;;  %v3267_v6 = vpop.xlane.xlu1 %3266  ;;  %v3280_v4 = vmul.f32 %v5632_v63, %v5632_v63  ;;  %4509 = vmatprep.subr.bf16.mxu0 %v4508_v61 }
 0xd49   : > { %v3274_v37 = vmul.f32 0.03125, %v3267_v6  ;;  %v3287_v51 = vsel %vm940_vm1, %v3281_v1, 0.0  ;;  %4511 = vmatpush3.bf16.msra.mxu0 %v4508_v61  ;;  %v4021_v61 = vld [vmem:[%s899_s14] ss:$0 sm:$0xff] }
 0xd4a   : > { %v5639_v56 = vsub.f32 %v3258_v49, %v3275_v2  ;;  %3288 = vadd.xlane.f32.xlu0 %v3287_v51  ;;  %v3284_v58 = vsel %vm940_vm1, %v3280_v4, 0.0 }
 0xd4b   : > { %v3278_v8 = vsub.f32 %v3257_v52, %v3274_v37  ;;  %3285 = vadd.xlane.f32.xlu1 %v3284_v58 }
 0xd4c   : > { %v3283_v11 = vmul.f32 %v5639_v56, %v5639_v56 }
 0xd4d   : > { %v3282_v57 = vmul.f32 %v3278_v8, %v3278_v8 }
 0xd4e   : > { %v3293_v7 = vsel %vm940_vm1, %v3283_v11, 0.0 }
 0xd4f   : > { %3294 = vadd.xlane.f32.xlu0 %v3293_v7  ;;  %v3290_v10 = vsel %vm940_vm1, %v3282_v57, 0.0  ;;  %v4016_v57 = vld [vmem:[%s896_s12] ss:$0 sm:$0xff] }
 0xd50   : > { %3291 = vadd.xlane.f32.xlu1 %v3290_v10 }
 0xdd7   : > { %v3289_v23 = vpop.xlane.xlu0 %3288 }
 0xdd8   : > { %v3297_v24 = vmul.f32 0.03125, %v3289_v23  ;;  %v3286_v25 = vpop.xlane.xlu1 %3285 }
 0xdd9   : > { %v3296_v26 = vmul.f32 0.03125, %v3286_v25 }
 0xdda   : > { %v3301_v27 = vadd.f32 1e-05, %v3297_v24 }
 0xddb   : > { %v3300_v28 = vadd.f32 1e-05, %v3296_v26 }
 0xddc   : > { %4743 = vrsqrt.f32 %v3301_v27  ;;  %v3295_v29 = vpop.xlane.xlu0 %3294 }
 0xddd   : > { %4745 = vrsqrt.f32 %v3300_v28  ;;  %v3299_v30 = vmul.f32 0.03125, %v3295_v29  ;;  %v3292_v31 = vpop.xlane.xlu1 %3291 }
 0xdde   : > { %v3298_v32 = vmul.f32 0.03125, %v3292_v31 }
 0xddf   : > { %v3303_v33 = vadd.f32 1e-05, %v3299_v30 }
 0xde0   : > { %v3302_v34 = vadd.f32 1e-05, %v3298_v32 }
 0xde1   : > { %4747 = vrsqrt.f32 %v3303_v33 }
 0xde2   : > { %4749 = vrsqrt.f32 %v3302_v34 }
 0xde6   : > { %v4744_v35 = vpop.eup %4743 }
 0xde7   : > { %v4746_v38 = vpop.eup %4745  ;;  %v3309_v39 = vmul.f32 %v4744_v35, %v5630_v62  ;;  %v4011_v62 = vld [vmem:[%s888_s25] ss:$0 sm:$0xff] }
 0xde8   : > { %v3308_v41 = vmul.f32 %v4746_v38, %v5632_v63 }
 0xde9   : > { %v3320_v43 = vmul.f32 %v4009_v36, %v3309_v39 }
 0xdea   : > { %v3319_v44 = vmul.f32 %v4009_v36, %v3308_v41 }
 0xdeb   : > { %v4748_v48 = vpop.eup %4747  ;;  %v3331_v49 = vadd.f32 %v4010_v42, %v3320_v43 }
 0xdec   : > { %v4750_v45 = vpop.eup %4749  ;;  %v3330_v46 = vadd.f32 %v4010_v42, %v3319_v44  ;;  %v3311_v47 = vmul.f32 %v4748_v48, %v5639_v56 }
 0xded   : > { %v3310_v50 = vmul.f32 %v4750_v45, %v3278_v8 }
 0xdee   : > { %4356 = vmatprep.mubr.msk.f32.mxu1 %vm940_vm1, %v3330_v46  ;;  %v3322_v52 = vmul.f32 %v4009_v36, %v3311_v47 }
 0xdef   : > { %4357 = vmatmul.mubr.msk.f32.vlgmr.msra.gmra.mrb[28].mxu1 %vm940_vm1, %v3331_v49  ;;  %v3321_v53 = vmul.f32 %v4009_v36, %v3310_v50 }
 0xdf0   : > { %v3333_v55 = vadd.f32 %v4010_v42, %v3322_v52 }
 0xdf1   : > { %v3332_v54 = vadd.f32 %v4010_v42, %v3321_v53 }
 0xdf3   : > { %4359 = vmatprep.mubr.msk.f32.mxu1 %vm940_vm1, %v3332_v54 }
 0xdf4   : > { %4360 = vmatmul.mubr.msk.f32.gmra.mrb[30].mxu1 %vm940_vm1, %v3333_v55 }
 0xec2   : > { %v4358_v63 = vpop.f32.mrb[28].mxu1 }
 0xec3   : > { %v3429_v0 = vadd.f32 %v4358_v63, %v4011_v62  ;;  %v3423_v1 = vpop.f32.mrb[29].mxu1 }
 0xec4   : > { %v3424_v2 = vadd.f32 %v4011_v62, %v3423_v1 }
 0xec5   : > { %v3443_v4 = vmax.f32 %v3429_v0, 0.0  ;;  %v4022_v0 = vld [vmem:[%s902_s23] ss:$0 sm:$0xff] }
 0xec6   : > { %v3442_v6 = vmax.f32 %v3424_v2, 0.0 }
 0xec7   : > { %v4361_v37 = vpop.f32.mrb[30].mxu1 }
 0xec8   : > { %v3439_v51 = vadd.f32 %v4361_v37, %v4011_v62  ;;  %v3433_v56 = vpop.f32.mrb[31].mxu1  ;;  %4378 = vmatprep.mubr.msk.f32.mxu0 %vm3461_vm5, %v3442_v6 }
 0xec9   : > { %v3434_v58 = vadd.f32 %v4011_v62, %v3433_v56  ;;  %4379 = vmatmul.mubr.msk.f32.vlgmr.msra.gmra.mrb[20].mxu0 %vm3461_vm5, %v3443_v4 }
 0xeca   : > { %v3445_v11 = vmax.f32 %v3439_v51, 0.0 }
 0xecb   : > { %v3444_v8 = vmax.f32 %v3434_v58, 0.0 }
 0xecd   : > { %4381 = vmatprep.mubr.msk.f32.mxu0 %vm3461_vm5, %v3444_v8 }
 0xece   : > { %4382 = vmatmul.mubr.msk.f32.gmra.mrb[22].mxu0 %vm3461_vm5, %v3445_v11 }
 0xf9c   : > { %v4380_v7 = vpop.f32.mrb[20].mxu0 }
 0xf9d   : > { %v3546_v10 = vadd.f32 %v4380_v7, %v4016_v57  ;;  %v3540_v12 = vpop.f32.mrb[21].mxu0 }
 0xf9e   : > { %v3541_v40 = vadd.f32 %v4016_v57, %v3540_v12 }
 0xf9f   : > { %v3560_v9 = vadd.f32 %v3546_v10, %v3331_v49 }
 0xfa0   : > { %v3559_v13 = vadd.f32 %v3541_v40, %v3330_v46 }
 0xfa1   : > { %v4383_v14 = vpop.f32.mrb[22].mxu0  ;;  %v3566_v15 = vsel %vm940_vm1, %v3560_v9, 0.0 }
 0xfa2   : > { %v3556_v16 = vadd.f32 %v4383_v14, %v4016_v57  ;;  %3567 = vadd.xlane.f32.xlu0 %v3566_v15  ;;  %v3550_v17 = vpop.f32.mrb[23].mxu0  ;;  %v3563_v18 = vsel %vm940_vm1, %v3559_v13, 0.0 }
 0xfa3   : > { %v3551_v19 = vadd.f32 %v4016_v57, %v3550_v17  ;;  %3564 = vadd.xlane.f32.xlu1 %v3563_v18 }
 0xfa4   : > { %v3562_v20 = vadd.f32 %v3556_v16, %v3333_v55 }
 0xfa5   : > { %v3561_v21 = vadd.f32 %v3551_v19, %v3332_v54 }
 0xfa6   : > { %v3572_v3 = vsel %vm940_vm1, %v3562_v20, 0.0 }
 0xfa7   : > { %3573 = vadd.xlane.f32.xlu0 %v3572_v3  ;;  %v3569_v22 = vsel %vm940_vm1, %v3561_v21, 0.0 }
 0xfa8   : > { %3570 = vadd.xlane.f32.xlu1 %v3569_v22 }
0x102f   : > { %v3568_v5 = vpop.xlane.xlu0 %3567 }
0x1030   : > { %v3576_v23 = vmul.f32 0.03125, %v3568_v5  ;;  %v3565_v24 = vpop.xlane.xlu1 %3564 }
0x1031   : > { %v3575_v25 = vmul.f32 0.03125, %v3565_v24 }
0x1032   : > { %v3580_v26 = vsub.f32 %v3560_v9, %v3576_v23 }
0x1033   : > { %v3579_v27 = vsub.f32 %v3559_v13, %v3575_v25 }
0x1034   : > { %v3574_v28 = vpop.xlane.xlu0 %3573  ;;  %v3584_v29 = vmul.f32 %v3580_v26, %v3580_v26 }
0x1035   : > { %v3578_v30 = vmul.f32 0.03125, %v3574_v28  ;;  %v3571_v31 = vpop.xlane.xlu1 %3570  ;;  %v3583_v32 = vmul.f32 %v3579_v27, %v3579_v27 }
0x1036   : > { %v3577_v33 = vmul.f32 0.03125, %v3571_v31  ;;  %v3590_v34 = vsel %vm940_vm1, %v3584_v29, 0.0 }
0x1037   : > { %v3582_v35 = vsub.f32 %v3562_v20, %v3578_v30  ;;  %3591 = vadd.xlane.f32.xlu0 %v3590_v34  ;;  %v3587_v36 = vsel %vm940_vm1, %v3583_v32, 0.0 }
0x1038   : > { %v3581_v38 = vsub.f32 %v3561_v21, %v3577_v33  ;;  %3588 = vadd.xlane.f32.xlu1 %v3587_v36 }
0x1039   : > { %v3586_v39 = vmul.f32 %v3582_v35, %v3582_v35 }
0x103a   : > { %v3585_v41 = vmul.f32 %v3581_v38, %v3581_v38 }
0x103b   : > { %v3596_v42 = vsel %vm940_vm1, %v3586_v39, 0.0 }
0x103c   : > { %3597 = vadd.xlane.f32.xlu0 %v3596_v42  ;;  %v3593_v43 = vsel %vm940_vm1, %v3585_v41, 0.0 }
0x103d   : > { %3594 = vadd.xlane.f32.xlu1 %v3593_v43 }
0x10c4   : > { %v3592_v44 = vpop.xlane.xlu0 %3591 }
0x10c5   : > { %v3600_v48 = vmul.f32 0.03125, %v3592_v44  ;;  %v3589_v45 = vpop.xlane.xlu1 %3588 }
0x10c6   : > { %v3599_v46 = vmul.f32 0.03125, %v3589_v45 }
0x10c7   : > { %v3604_v47 = vadd.f32 1e-05, %v3600_v48 }
0x10c8   : > { %v3603_v49 = vadd.f32 1e-05, %v3599_v46 }
0x10c9   : > { %4751 = vrsqrt.f32 %v3604_v47  ;;  %v3598_v50 = vpop.xlane.xlu0 %3597 }
0x10ca   : > { %4753 = vrsqrt.f32 %v3603_v49  ;;  %v3602_v52 = vmul.f32 0.03125, %v3598_v50  ;;  %v3595_v53 = vpop.xlane.xlu1 %3594 }
0x10cb   : > { %v3601_v54 = vmul.f32 0.03125, %v3595_v53 }
0x10cc   : > { %v3606_v55 = vadd.f32 1e-05, %v3602_v52 }
0x10cd   : > { %v3605_v59 = vadd.f32 1e-05, %v3601_v54 }
0x10ce   : > { %4755 = vrsqrt.f32 %v3606_v55 }
0x10cf   : > { %4757 = vrsqrt.f32 %v3605_v59 }
0x10d3   : > { %v4752_v60 = vpop.eup %4751 }
0x10d4   : > { %v4754_v62 = vpop.eup %4753  ;;  %v3612_v63 = vmul.f32 %v4752_v60, %v3580_v26 }
0x10d5   : > { %v3611_v1 = vmul.f32 %v4754_v62, %v3579_v27 }
0x10d6   : > { %v3623_v2 = vmul.f32 %v4021_v61, %v3612_v63 }
0x10d7   : > { %v3622_v6 = vmul.f32 %v4021_v61, %v3611_v1 }
0x10d8   : > { %v4756_v4 = vpop.eup %4755  ;;  %v3634_v37 = vadd.f32 %v4022_v0, %v3623_v2 }
0x10d9   : > { %v4758_v51 = vpop.eup %4757  ;;  %v3633_v56 = vadd.f32 %v4022_v0, %v3622_v6  ;;  %v3614_v58 = vmul.f32 %v4756_v4, %v3582_v35 }
0x10da   : > { %3638 = vst.msk [vmem:[#allocation2 + $0x8] sm:$0xff] %vm940_vm1, %v3634_v37  ;;  %v3613_v8 = vmul.f32 %v4758_v51, %v3581_v38  ;;  %3644 = sbr.rel (%p4023_p0) target bundleno = 4321 (0x10e1), region = 116  ;;  %3646 = vst.msk [vmem:[#allocation10 + $0x8] sm:$0xff] (!%p4023_p0), %vm940_vm1, %v3634_v37 }
0x10db   : > { %3637 = vst.msk [vmem:[#allocation2] sm:$0xff] %vm940_vm1, %v3633_v56  ;;  %v3625_v11 = vmul.f32 %v4021_v61, %v3614_v58  ;;  %3645 = vst.msk [vmem:[#allocation10] sm:$0xff] (!%p4023_p0), %vm940_vm1, %v3633_v56 }
0x10dc   : > { %v3624_v57 = vmul.f32 %v4021_v61, %v3613_v8 }
0x10dd   : > { %v3636_v7 = vadd.f32 %v4022_v0, %v3625_v11 }
0x10de   : > { %v3635_v10 = vadd.f32 %v4022_v0, %v3624_v57 }
0x10df   : > { %3640 = vst.msk [vmem:[#allocation2 + $0x18] sm:$0xff] %vm940_vm1, %v3636_v7  ;;  %3648 = vst.msk [vmem:[#allocation10 + $0x18] sm:$0xff] (!%p4023_p0), %vm940_vm1, %v3636_v7 }
0x10e0   : > { %3639 = vst.msk [vmem:[#allocation2 + $0x10] sm:$0xff] %vm940_vm1, %v3635_v10  ;;  %3647 = vst.msk [vmem:[#allocation10 + $0x10] sm:$0xff] (!%p4023_p0), %vm940_vm1, %v3635_v10 }
0x10e1 PF: > { %s5871_s14 = sld [smem:[#allocation19_spill]]  ;;  %s4978_s18 = smov [#allocation10]  }
0x10e2   : > { %s3659_s23 = sshll.u32 %s4978_s18, 4  ;;  %s3660_s23 = int_to_ptr.vmem [resolvable:$true] %s3659_s23 }
0x10e3   : > { %s4879_s26 = scalar_lea.vmem %s3660_s23, 512  ;;  %p4886_p6 = scmp.lt.s32.totalorder %s3660_s23, %s3660_s23 }
0x10e4   : > { %p4880_p2 = scmp.ne.s32.totalorder %s3660_s23, %s4879_s26  ;;  %p4887_p10 = scmp.lt.s32.totalorder %s4879_s26, %s4879_s26 }
0x10e6   : > { %p4888_p11 = por %p4887_p10, %p4886_p6 }
0x10e7   : > { %p4559_p12 = scmp.eq.s32.totalorder %s5871_s14, 1 }
0x10e9   : > { %p4881_p9 = pnand %p4880_p2, %p4559_p12 }
0x10eb   : > { %p4882_p3 = pneg %p4881_p9 }
0x10ed   : > { %p4889_p8 = pnand %p4888_p11, %p4882_p3 }
0x10ef   : > { %4892 = shalt.err (!%p4889_p8)
}
0x10f0   : > { %s5872_s24 = sld [smem:[#allocation38_spill]] }
0x10f6   : > { %s4893_s9 = scalar_lea.hbm %s5872_s24, 512 }
0x10f7   : > { %p4894_p1 = scmp.ne.s32.totalorder %s5872_s24, %s4893_s9  ;;  %p4899_p5 = scmp.lt.u32.totalorder %s4893_s9, %s5872_s24 }
0x10f9   : > { %p4895_p4 = pnand %p4894_p1, %p4559_p12 }
0x10fb   : > { %p4896_p13 = pneg %p4895_p4 }
0x10fd   : > { %p4901_p7 = pnand %p4899_p5, %p4896_p13 }
0x10ff   : > { %4904 = shalt.err (!%p4901_p7)
}
0x1100   : > { %s4979_s27 = smov 128   ;;  %s4980_s7 = smov 8  }
0x1101   : > { %4537 = dma.vmem_to_hbm [thread:$0]  (%p4559_p12), %s3660_s23, 512, %s5872_s24, [#allocation5], %s4979_s27, %s4979_s27, %s4980_s7  }
0x1102   : > { %4942 = dma.done.wait (%p4559_p12), [#allocation5], 512  }
0x1103   : > { %4944 = vsyncadd (%p4559_p12), [#allocation5], 4294966784 }
0x1104 PF: > { %s5873_s1 = sld [smem:[#allocation18_spill]]  ;;  %s5874_s27 = sld [smem:[#allocation15_spill]] }
0x1105   : > { %s5875_s28 = sld [smem:[#allocation16_spill]]  ;;  %s5876_s29 = sld [smem:[#allocation21_spill]] }
0x1106   : > { %s5877_s30 = sld [smem:[#allocation17_spill]]  ;;  %s5878_s0 = sld [smem:[#allocation20_spill]] }
0x110a   : > { %s31_s19 = sadd.s32 1, %s5873_s1  }
0x110b   : > { %p28_p0 = scmp.ge.s32.totalorder %s31_s19, 4  }
0x110d   :  { %30 = sbr.rel (!%p28_p0) target bundleno = 23 (0x17), region = 200 }
0x1114   :  { %3675 = vsyncpa [#allocation4], 1 }
0x1115   :  { %3677 = vsyncpa [#allocation4 + $0x1], 1 }
0x1116   :  { %3678 = vsyncpa [#allocation7], 1 }
0x1117   :  { %3679 = vsyncpa [#allocation5], 1 }
0x1118   :  { %3681 = vsyncpa [#allocation5 + $0x1], 1 }

</bundles_post_ra>
